<compile_context>
chip_gen: v7x
topology: tpu7x:2x2x1
jax: 0.10.0
libtpu: 0.0.40
codegen_flags: <defaults>
</compile_context>

<pallas_src>
import jax
import jax.numpy as jnp
from jax import lax
from jax.experimental import pallas as pl
from jax.experimental.pallas import tpu as pltpu

# ----------------------------- config (small) -------------------------------
B = 2             # batch
S = 8             # sequence length
H = 32            # hidden size        (stand-in for config.hidden_size = 768)
NH = 4            # attention heads
HD = H // NH      # head dim
I = 64            # FFN intermediate size
L = 2             # encoder layers
FC1_OUT = 64      # fc1 out_features (as in the module)
NUM_CLASSES = 3   # num_classes
VOCAB = 100


# ----------------------------- shared helpers -------------------------------
def layer_norm(x, gamma, beta, eps=1e-5):
    mean = jnp.mean(x, axis=-1, keepdims=True)
    var = jnp.mean((x - mean) ** 2, axis=-1, keepdims=True)
    return (x - mean) * lax.rsqrt(var + eps) * gamma + beta


def gelu(x):
    # TODO(synk): RoBERTa uses erf-GELU; tanh-approx is used for TPU lowering.
    return jax.nn.gelu(x, approximate=True)


def _bf16(x):
    return x.astype(jnp.bfloat16)


# ----------------------------- fused Pallas kernel ---------------------------
def fused_bertweet_kernel(
        # inputs
        h0_ref, bias_ref,
        wq_ref, bq_ref, wk_ref, bk_ref, wv_ref, bv_ref,
        wo_ref, bo_ref, ln1g_ref, ln1b_ref,
        wi_ref, bi_ref, wo2_ref, bo2_ref, ln2g_ref, ln2b_ref,
        wp_ref, bp_ref, w1_ref, b1_ref, w2_ref, b2_ref,
        # outputs
        logits_ref, attn_ref,
        # scratch
        h_scr):
    """Grid point (b, l): one encoder layer for one batch element.

    h_scr    : (S, H) f32 hidden state, carried across the "arbitrary" L axis.
    attn_ref : (NH, S, S) attention probs of this (layer, batch) block.
    logits_ref: (S, NUM_CLASSES); written only on the last layer step (the
                wrapper keeps row 0 = CLS).
    """
    l = pl.program_id(1)

    @pl.when(l == 0)
    def _init():
        h_scr[...] = h0_ref[...]

    h = h_scr[...]                     # (S, H) f32 residual stream
    hb = _bf16(h)                      # bf16 matmul operand only
    bias = bias_ref[...]               # (S, S) f32 key-padding bias (0 / -1e9)

    # --- attention: head-major weights, no lane-offset slicing --------------
    attn_acc = jnp.zeros((S, H), jnp.float32)
    for n in range(NH):                # static unroll (NH small)
        # Wq/bq are pre-scaled by 1/sqrt(HD) in the wrapper.
        qh = jnp.dot(hb, wq_ref[n], preferred_element_type=jnp.float32) + bq_ref[n]
        kh = jnp.dot(hb, wk_ref[n], preferred_element_type=jnp.float32) + bk_ref[n]
        vh = jnp.dot(hb, wv_ref[n], preferred_element_type=jnp.float32) + bv_ref[n]
        # scores = q @ k^T (contract last dims; no explicit transpose relayout)
        s = lax.dot_general(_bf16(qh), _bf16(kh), (((1,), (1,)), ((), ())),
                            preferred_element_type=jnp.float32) + bias
        m = jnp.max(s, axis=-1, keepdims=True)
        e = jnp.exp(s - m)             # padded keys -> exactly 0 (f32)
        p = e * pl.reciprocal(jnp.sum(e, axis=-1, keepdims=True), approx=True)
        attn_ref[n] = p                # full-tile (S, S) store
        ctx = jnp.dot(_bf16(p), _bf16(vh), preferred_element_type=jnp.float32)
        # partial output projection: (S,HD)@(HD,H) accumulated in f32
        attn_acc = attn_acc + jnp.dot(_bf16(ctx), wo_ref[n],
                                      preferred_element_type=jnp.float32)

    h1 = layer_norm(h + attn_acc + bo_ref[...], ln1g_ref[...], ln1b_ref[...])

    # --- FFN (bf16 operands, f32 accumulate) ---------------------------------
    inter = gelu(jnp.dot(_bf16(h1), wi_ref[...],
                         preferred_element_type=jnp.float32) + bi_ref[...])
    ffn = jnp.dot(_bf16(inter), wo2_ref[...],
                  preferred_element_type=jnp.float32) + bo2_ref[...]
    h_new = layer_norm(h1 + ffn, ln2g_ref[...], ln2b_ref[...])
    h_scr[...] = h_new

    # --- pooler + classifier head on the last layer step --------------------
    # (Head runs on the whole (S, H) slab; the wrapper keeps the CLS row.  At
    #  bertweet-base scale you would pl.Buffered(1) these const specs or move
    #  the head to plain XLA to reclaim VMEM residency.)
    @pl.when(l == pl.num_programs(1) - 1)
    def _head():
        pooled = jnp.tanh(jnp.dot(_bf16(h_new), wp_ref[...],
                                  preferred_element_type=jnp.float32) + bp_ref[...])
        # dropout(pooled) -> identity (eval)
        x = jnp.maximum(jnp.dot(_bf16(pooled), w1_ref[...],
                                preferred_element_type=jnp.float32) + b1_ref[...], 0.0)
        # dropout(relu(fc1)) -> identity (eval)
        logits_ref[...] = jnp.dot(_bf16(x), w2_ref[...],
                                  preferred_element_type=jnp.float32) + b2_ref[...]


# ----------------------------- Pallas wrapper --------------------------------
def _batch_spec(*dims):
    """Per-batch block (leading B squeezed), constant across layers."""
    return pl.BlockSpec((None,) + dims, lambda b, l, _n=len(dims): (b,) + (0,) * _n)


def _layer_spec(*dims):
    """Per-layer stacked weights (leading L squeezed)."""
    return pl.BlockSpec((None,) + dims, lambda b, l, _n=len(dims): (l,) + (0,) * _n)


def _const_spec(*dims):
    """Whole array, same block for every grid step (head params)."""
    return pl.BlockSpec(dims, lambda b, l, _n=len(dims): (0,) * _n)


@jax.jit
def bertweet_forward(input_ids, attention_mask, emb, layers, head):
    # Embedding lookup + embedding LayerNorm: plain-JAX glue (gather).
    h = emb["word"][input_ids] + emb["pos"][None, :, :]
    h0 = layer_norm(h, emb["ln_g"], emb["ln_b"]).astype(jnp.float32)   # (B,S,H)

    # Per-batch additive key-padding bias: 0 for real keys, -1e9 for padded.
    keep = attention_mask > 0.5                                        # (B, S)
    bias = jnp.where(keep[:, None, :], 0.0, -1e9).astype(jnp.float32)  # (B,1,S)
    bias = jnp.broadcast_to(bias, (B, S, S))

    # Fold 1/sqrt(HD) into Wq/bq; build head-major weight layouts (once).
    scale = 1.0 / float(HD) ** 0.5

    def qkv_heads(w, b, s=1.0):
        w3 = (w * s).reshape(L, H, NH, HD).transpose(0, 2, 1, 3)       # (L,NH,H,HD)
        b3 = (b * s).reshape(L, NH, 1, HD)
        return _bf16(w3), b3.astype(jnp.float32)

    wq3, bq3 = qkv_heads(layers["wq"], layers["bq"], scale)
    wk3, bk3 = qkv_heads(layers["wk"], layers["bk"])
    wv3, bv3 = qkv_heads(layers["wv"], layers["bv"])
    wo3 = _bf16(layers["wo"].reshape(L, NH, HD, H))                    # (L,NH,HD,H)

    in_specs = [
        _batch_spec(S, H),                                  # h0
        _batch_spec(S, S),                                  # padding bias
        _layer_spec(NH, H, HD), _layer_spec(NH, 1, HD),     # wq, bq (head-major)
        _layer_spec(NH, H, HD), _layer_spec(NH, 1, HD),     # wk, bk
        _layer_spec(NH, H, HD), _layer_spec(NH, 1, HD),     # wv, bv
        _layer_spec(NH, HD, H), _layer_spec(1, H),          # wo (head-major), bo
        _layer_spec(1, H), _layer_spec(1, H),               # ln1 gamma, beta
        _layer_spec(H, I), _layer_spec(1, I),               # wi, bi
        _layer_spec(I, H), _layer_spec(1, H),               # wo2, bo2
        _layer_spec(1, H), _layer_spec(1, H),               # ln2 gamma, beta
        _const_spec(H, H), _const_spec(1, H),               # pooler
        _const_spec(H, FC1_OUT), _const_spec(1, FC1_OUT),   # fc1
        _const_spec(FC1_OUT, NUM_CLASSES), _const_spec(1, NUM_CLASSES),  # fc2
    ]
    out_specs = (
        pl.BlockSpec((None, S, NUM_CLASSES), lambda b, l: (b, 0, 0)),      # logits
        pl.BlockSpec((None, None, NH, S, S), lambda b, l: (l, b, 0, 0, 0)),  # attn
    )
    out_shape = (
        jax.ShapeDtypeStruct((B, S, NUM_CLASSES), jnp.float32),
        jax.ShapeDtypeStruct((L, B, NH, S, S), jnp.float32),
    )

    logits_all, attn_all = pl.pallas_call(
        fused_bertweet_kernel,
        grid=(B, L),
        in_specs=in_specs,
        out_specs=out_specs,
        out_shape=out_shape,
        scratch_shapes=[pltpu.VMEM((S, H), jnp.float32)],   # hidden-state carry
        compiler_params=pltpu.CompilerParams(
            # batch axis parallel (v7x 2-TC sharding), layer axis carries state.
            dimension_semantics=("parallel", "arbitrary"),
            vmem_limit_bytes=32 * 1024 * 1024),
    )(
        h0, bias,
        wq3, bq3, wk3, bk3, wv3, bv3,
        wo3, layers["bo"],
        layers["ln1_g"], layers["ln1_b"],
        _bf16(layers["wi"]), layers["bi"],
        _bf16(layers["wo2"]), layers["bo2"],
        layers["ln2_g"], layers["ln2_b"],
        _bf16(head["wp"]), head["bp"],
        _bf16(head["w1"]), head["b1"],
        _bf16(head["w2"]), head["b2"],
    )

    logits = logits_all[:, 0, :]                       # CLS row per batch
    attentions = tuple(attn_all[l] for l in range(L))  # (B, NH, S, S) per layer
    return logits, attentions


# ----------------------------- parameter init --------------------------------
def init_params(key):
    def nrm(k, shape, scale=0.02):
        return (scale * jax.random.normal(k, shape)).astype(jnp.float32)

    keys = iter(jax.random.split(key, 16))
    emb = {
        "word": nrm(next(keys), (VOCAB, H)),
        "pos": nrm(next(keys), (S, H)),
        "ln_g": jnp.ones((1, 1, H), jnp.float32),
        "ln_b": jnp.zeros((1, 1, H), jnp.float32),
    }
    layers = {
        "wq": nrm(next(keys), (L, H, H)), "bq": jnp.zeros((L, 1, H), jnp.float32),
        "wk": nrm(next(keys), (L, H, H)), "bk": jnp.zeros((L, 1, H), jnp.float32),
        "wv": nrm(next(keys), (L, H, H)), "bv": jnp.zeros((L, 1, H), jnp.float32),
        "wo": nrm(next(keys), (L, H, H)), "bo": jnp.zeros((L, 1, H), jnp.float32),
        "ln1_g": jnp.ones((L, 1, H), jnp.float32),
        "ln1_b": jnp.zeros((L, 1, H), jnp.float32),
        "wi": nrm(next(keys), (L, H, I)), "bi": jnp.zeros((L, 1, I), jnp.float32),
        "wo2": nrm(next(keys), (L, I, H)), "bo2": jnp.zeros((L, 1, H), jnp.float32),
        "ln2_g": jnp.ones((L, 1, H), jnp.float32),
        "ln2_b": jnp.zeros((L, 1, H), jnp.float32),
    }
    head = {
        "wp": nrm(next(keys), (H, H)), "bp": jnp.zeros((1, H), jnp.float32),
        "w1": nrm(next(keys), (H, FC1_OUT), 0.1),
        "b1": jnp.zeros((1, FC1_OUT), jnp.float32),
        "w2": nrm(next(keys), (FC1_OUT, NUM_CLASSES), 0.1),
        "b2": jnp.zeros((1, NUM_CLASSES), jnp.float32),
    }
    return emb, layers, head


# ----------------------------- pure-JAX reference ----------------------------
# Mirrors the kernel's mixed precision: bf16 matmul operands, f32 accumulation,
# f32 bias / softmax / LayerNorm, so the comparison against the kernel is tight.
def reference_forward(input_ids, attention_mask, emb, layers, head):
    f32 = jnp.float32
    h = emb["word"][input_ids] + emb["pos"][None, :, :]
    h = layer_norm(h, emb["ln_g"], emb["ln_b"]).astype(f32)
    bias = jnp.where(attention_mask[:, None, None, :] > 0.5, 0.0, -1e9)  # (B,1,1,S)
    scale = 1.0 / float(HD) ** 0.5
    attns = []
    for l in range(L):
        wq = _bf16(layers["wq"][l] * scale); bq = layers["bq"][l] * scale
        wk = _bf16(layers["wk"][l]); bk = layers["bk"][l]
        wv = _bf16(layers["wv"][l]); bv = layers["bv"][l]
        wo = _bf16(layers["wo"][l]); bo = layers["bo"][l]
        g1, be1 = layers["ln1_g"][l], layers["ln1_b"][l]
        wi = _bf16(layers["wi"][l]); bi = layers["bi"][l]
        wo2 = _bf16(layers["wo2"][l]); bo2 = layers["bo2"][l]
        g2, be2 = layers["ln2_g"][l], layers["ln2_b"][l]

        hb = _bf16(h)
        q = jnp.einsum("bsh,hd->bsd", hb, wq, preferred_element_type=f32) + bq
        k = jnp.einsum("bsh,hd->bsd", hb, wk, preferred_element_type=f32) + bk
        v = jnp.einsum("bsh,hd->bsd", hb, wv, preferred_element_type=f32) + bv
        q = q.reshape(B, S, NH, HD).transpose(0, 2, 1, 3)
        k = k.reshape(B, S, NH, HD).transpose(0, 2, 1, 3)
        v = v.reshape(B, S, NH, HD).transpose(0, 2, 1, 3)
        scores = jnp.einsum("bhqd,bhkd->bhqk", _bf16(q), _bf16(k),
                            preferred_element_type=f32) + bias
        probs = jax.nn.softmax(scores, axis=-1)
        attns.append(probs)
        ctx = jnp.einsum("bhqk,bhkd->bhqd", _bf16(probs), _bf16(v),
                         preferred_element_type=f32)
        ctx = ctx.transpose(0, 2, 1, 3).reshape(B, S, H)
        attn_out = jnp.einsum("bsh,hk->bsk", _bf16(ctx), wo,
                              preferred_element_type=f32) + bo
        h1 = layer_norm(h + attn_out, g1, be1)
        inter = gelu(jnp.einsum("bsh,hi->bsi", _bf16(h1), wi,
                                preferred_element_type=f32) + bi)
        ffn = jnp.einsum("bsi,ih->bsh", _bf16(inter), wo2,
                         preferred_element_type=f32) + bo2
        h = layer_norm(h1 + ffn, g2, be2)

    pooled = jnp.tanh(jnp.einsum("bh,hk->bk", _bf16(h[:, 0, :]), _bf16(head["wp"]),
                                 preferred_element_type=f32) + head["bp"])
    x = jnp.maximum(jnp.einsum("bh,hk->bk", _bf16(pooled), _bf16(head["w1"]),
                               preferred_element_type=f32) + head["b1"], 0.0)
    logits = jnp.einsum("bh,hk->bk", _bf16(x), _bf16(head["w2"]),
                        preferred_element_type=f32) + head["b2"]
    return logits, tuple(attns)


# ----------------------------- main -------------------------------------------
if __name__ == "__main__":
    key = jax.random.PRNGKey(0)
    k_ids, k_params = jax.random.split(key)

    input_ids = jax.random.randint(k_ids, (B, S), 0, VOCAB, dtype=jnp.int32)
    attention_mask = jnp.ones((B, S), jnp.float32).at[1, S - 2:].set(0.0)  # pad ex. 2

    emb, layers, head = init_params(k_params)

    logits, attentions = bertweet_forward(input_ids, attention_mask, emb, layers, head)
    jax.block_until_ready(logits)
    jax.block_until_ready(attentions)

    ref_logits, ref_attn = reference_forward(input_ids, attention_mask, emb, layers, head)
    assert logits.shape == (B, NUM_CLASSES)
    assert len(attentions) == L and attentions[0].shape == (B, NH, S, S)
    assert jnp.allclose(logits, ref_logits, atol=5e-3, rtol=5e-3), (
        float(jnp.max(jnp.abs(logits - ref_logits))))
    for a, r in zip(attentions, ref_attn):
        assert jnp.allclose(a, r, atol=2e-3, rtol=2e-3), (
            float(jnp.max(jnp.abs(a - r))))

    # TODO(synk): the pretrained vinai/bertweet-base weights / tokenizer cannot
    # be loaded here; the backbone uses deterministic synthetic parameters.
    print("KERNEL_OK")
</pallas_src>

<mosaic_0001>
module attributes {stable_mosaic.version = 11 : i64} {
  func.func @fused_bertweet_kernel(%arg0: i32, %arg1: i32, %arg2: memref<1x8x32xf32, #tpu.memory_space<vmem>>, %arg3: memref<1x8x8xf32, #tpu.memory_space<vmem>>, %arg4: memref<1x4x32x8xbf16, #tpu.memory_space<vmem>>, %arg5: memref<1x4x1x8xf32, #tpu.memory_space<vmem>>, %arg6: memref<1x4x32x8xbf16, #tpu.memory_space<vmem>>, %arg7: memref<1x4x1x8xf32, #tpu.memory_space<vmem>>, %arg8: memref<1x4x32x8xbf16, #tpu.memory_space<vmem>>, %arg9: memref<1x4x1x8xf32, #tpu.memory_space<vmem>>, %arg10: memref<1x4x8x32xbf16, #tpu.memory_space<vmem>>, %arg11: memref<1x1x32xf32, #tpu.memory_space<vmem>>, %arg12: memref<1x1x32xf32, #tpu.memory_space<vmem>>, %arg13: memref<1x1x32xf32, #tpu.memory_space<vmem>>, %arg14: memref<1x32x64xbf16, #tpu.memory_space<vmem>>, %arg15: memref<1x1x64xf32, #tpu.memory_space<vmem>>, %arg16: memref<1x64x32xbf16, #tpu.memory_space<vmem>>, %arg17: memref<1x1x32xf32, #tpu.memory_space<vmem>>, %arg18: memref<1x1x32xf32, #tpu.memory_space<vmem>>, %arg19: memref<1x1x32xf32, #tpu.memory_space<vmem>>, %arg20: memref<32x32xbf16, #tpu.memory_space<vmem>>, %arg21: memref<1x32xf32, #tpu.memory_space<vmem>>, %arg22: memref<32x64xbf16, #tpu.memory_space<vmem>>, %arg23: memref<1x64xf32, #tpu.memory_space<vmem>>, %arg24: memref<64x3xbf16, #tpu.memory_space<vmem>>, %arg25: memref<1x3xf32, #tpu.memory_space<vmem>>, %arg26: memref<1x8x3xf32, #tpu.memory_space<vmem>>, %arg27: memref<1x1x4x8x8xf32, #tpu.memory_space<vmem>>, %arg28: memref<8x32xf32, #tpu.memory_space<vmem>>) attributes {dimension_semantics = [#tpu.dimension_semantics<parallel>, #tpu.dimension_semantics<arbitrary>], iteration_bounds = array<i64: 2, 2>, scalar_prefetch = 0 : i64, scratch_operands = 1 : i64, tpu.core_type = #tpu.core_type<tc>, window_params = [{transform_indices = @transform_0, window_bounds = array<i64: 1, 8, 32>}, {transform_indices = @transform_1, window_bounds = array<i64: 1, 8, 8>}, {transform_indices = @transform_2, window_bounds = array<i64: 1, 4, 32, 8>}, {transform_indices = @transform_3, window_bounds = array<i64: 1, 4, 1, 8>}, {transform_indices = @transform_4, window_bounds = array<i64: 1, 4, 32, 8>}, {transform_indices = @transform_5, window_bounds = array<i64: 1, 4, 1, 8>}, {transform_indices = @transform_6, window_bounds = array<i64: 1, 4, 32, 8>}, {transform_indices = @transform_7, window_bounds = array<i64: 1, 4, 1, 8>}, {transform_indices = @transform_8, window_bounds = array<i64: 1, 4, 8, 32>}, {transform_indices = @transform_9, window_bounds = array<i64: 1, 1, 32>}, {transform_indices = @transform_10, window_bounds = array<i64: 1, 1, 32>}, {transform_indices = @transform_11, window_bounds = array<i64: 1, 1, 32>}, {transform_indices = @transform_12, window_bounds = array<i64: 1, 32, 64>}, {transform_indices = @transform_13, window_bounds = array<i64: 1, 1, 64>}, {transform_indices = @transform_14, window_bounds = array<i64: 1, 64, 32>}, {transform_indices = @transform_15, window_bounds = array<i64: 1, 1, 32>}, {transform_indices = @transform_16, window_bounds = array<i64: 1, 1, 32>}, {transform_indices = @transform_17, window_bounds = array<i64: 1, 1, 32>}, {pipeline_mode = #tpu.pipeline_mode<synchronous>, transform_indices = @transform_18, window_bounds = array<i64: 32, 32>}, {pipeline_mode = #tpu.pipeline_mode<synchronous>, transform_indices = @transform_19, window_bounds = array<i64: 1, 32>}, {pipeline_mode = #tpu.pipeline_mode<synchronous>, transform_indices = @transform_20, window_bounds = array<i64: 32, 64>}, {pipeline_mode = #tpu.pipeline_mode<synchronous>, transform_indices = @transform_21, window_bounds = array<i64: 1, 64>}, {pipeline_mode = #tpu.pipeline_mode<synchronous>, transform_indices = @transform_22, window_bounds = array<i64: 64, 3>}, {pipeline_mode = #tpu.pipeline_mode<synchronous>, transform_indices = @transform_23, window_bounds = array<i64: 1, 3>}, {transform_indices = @transform_24, window_bounds = array<i64: 1, 8, 3>}, {transform_indices = @transform_25, window_bounds = array<i64: 1, 1, 4, 8, 8>}]} {
    %c0_i32 = arith.constant 0 : i32
    %0 = arith.cmpi eq, %arg1, %c0_i32 : i32
    %1 = arith.extui %0 : i1 to i32
    %c0_i32_0 = arith.constant 0 : i32
    %2 = arith.cmpi ne, %1, %c0_i32_0 : i32
    scf.if %2 {
      %c0_212 = arith.constant 0 : index
      %c0_213 = arith.constant 0 : index
      %c0_214 = arith.constant 0 : index
      %283 = vector.load %arg2[%c0_212, %c0_213, %c0_214] : memref<1x8x32xf32, #tpu.memory_space<vmem>>, vector<1x8x32xf32>
      %284 = vector.shape_cast %283 : vector<1x8x32xf32> to vector<8x32xf32>
      %c0_215 = arith.constant 0 : index
      %c0_216 = arith.constant 0 : index
      %285 = vector.load %arg28[%c0_215, %c0_216] : memref<8x32xf32, #tpu.memory_space<vmem>>, vector<8x32xf32>
      tpu.vector_store %arg28[%c0_215, %c0_216], %284 {strides = array<i32>} : memref<8x32xf32, #tpu.memory_space<vmem>>, vector<8x32xf32>,
    } else {
    }
    %c0 = arith.constant 0 : index
    %c0_1 = arith.constant 0 : index
    %3 = vector.load %arg28[%c0, %c0_1] : memref<8x32xf32, #tpu.memory_space<vmem>>, vector<8x32xf32>
    %4 = arith.truncf %3 : vector<8x32xf32> to vector<8x32xbf16>
    %c0_2 = arith.constant 0 : index
    %c0_3 = arith.constant 0 : index
    %c0_4 = arith.constant 0 : index
    %5 = vector.load %arg3[%c0_2, %c0_3, %c0_4] : memref<1x8x8xf32, #tpu.memory_space<vmem>>, vector<1x8x8xf32>
    %6 = vector.shape_cast %5 : vector<1x8x8xf32> to vector<8x8xf32>
    %cst = arith.constant 0.000000e+00 : f32
    %7 = vector.broadcast %cst : f32 to vector<8x32xf32>
    %c0_5 = arith.constant 0 : index
    %c0_6 = arith.constant 0 : index
    %c0_7 = arith.constant 0 : index
    %c0_8 = arith.constant 0 : index
    %8 = vector.load %arg4[%c0_5, %c0_6, %c0_7, %c0_8] : memref<1x4x32x8xbf16, #tpu.memory_space<vmem>>, vector<1x1x32x8xbf16>
    %9 = vector.shape_cast %8 : vector<1x1x32x8xbf16> to vector<32x8xbf16>
    %cst_9 = arith.constant dense<0.000000e+00> : vector<8x8xf32>
    %10 = tpu.matmul %4, %9, %cst_9 {dimension_numbers = #tpu.dot_dimension_numbers<[1], [0], [0], [1], [0, 0, 1, 1], [], []>} : vector<8x32xbf16>, vector<32x8xbf16>, vector<8x8xf32> -> vector<8x8xf32>
    %c0_10 = arith.constant 0 : index
    %c0_11 = arith.constant 0 : index
    %c0_12 = arith.constant 0 : index
    %c0_13 = arith.constant 0 : index
    %11 = vector.load %arg5[%c0_10, %c0_11, %c0_12, %c0_13] : memref<1x4x1x8xf32, #tpu.memory_space<vmem>>, vector<1x1x1x8xf32>
    %12 = vector.shape_cast %11 : vector<1x1x1x8xf32> to vector<1x8xf32>
    %13 = vector.broadcast %12 : vector<1x8xf32> to vector<8x8xf32>
    %14 = arith.addf %10, %13 : vector<8x8xf32>
    %c0_14 = arith.constant 0 : index
    %c0_15 = arith.constant 0 : index
    %c0_16 = arith.constant 0 : index
    %c0_17 = arith.constant 0 : index
    %15 = vector.load %arg6[%c0_14, %c0_15, %c0_16, %c0_17] : memref<1x4x32x8xbf16, #tpu.memory_space<vmem>>, vector<1x1x32x8xbf16>
    %16 = vector.shape_cast %15 : vector<1x1x32x8xbf16> to vector<32x8xbf16>
    %cst_18 = arith.constant dense<0.000000e+00> : vector<8x8xf32>
    %17 = tpu.matmul %4, %16, %cst_18 {dimension_numbers = #tpu.dot_dimension_numbers<[1], [0], [0], [1], [0, 0, 1, 1], [], []>} : vector<8x32xbf16>, vector<32x8xbf16>, vector<8x8xf32> -> vector<8x8xf32>
    %c0_19 = arith.constant 0 : index
    %c0_20 = arith.constant 0 : index
    %c0_21 = arith.constant 0 : index
    %c0_22 = arith.constant 0 : index
    %18 = vector.load %arg7[%c0_19, %c0_20, %c0_21, %c0_22] : memref<1x4x1x8xf32, #tpu.memory_space<vmem>>, vector<1x1x1x8xf32>
    %19 = vector.shape_cast %18 : vector<1x1x1x8xf32> to vector<1x8xf32>
    %20 = vector.broadcast %19 : vector<1x8xf32> to vector<8x8xf32>
    %21 = arith.addf %17, %20 : vector<8x8xf32>
    %c0_23 = arith.constant 0 : index
    %c0_24 = arith.constant 0 : index
    %c0_25 = arith.constant 0 : index
    %c0_26 = arith.constant 0 : index
    %22 = vector.load %arg8[%c0_23, %c0_24, %c0_25, %c0_26] : memref<1x4x32x8xbf16, #tpu.memory_space<vmem>>, vector<1x1x32x8xbf16>
    %23 = vector.shape_cast %22 : vector<1x1x32x8xbf16> to vector<32x8xbf16>
    %cst_27 = arith.constant dense<0.000000e+00> : vector<8x8xf32>
    %24 = tpu.matmul %4, %23, %cst_27 {dimension_numbers = #tpu.dot_dimension_numbers<[1], [0], [0], [1], [0, 0, 1, 1], [], []>} : vector<8x32xbf16>, vector<32x8xbf16>, vector<8x8xf32> -> vector<8x8xf32>
    %c0_28 = arith.constant 0 : index
    %c0_29 = arith.constant 0 : index
    %c0_30 = arith.constant 0 : index
    %c0_31 = arith.constant 0 : index
    %25 = vector.load %arg9[%c0_28, %c0_29, %c0_30, %c0_31] : memref<1x4x1x8xf32, #tpu.memory_space<vmem>>, vector<1x1x1x8xf32>
    %26 = vector.shape_cast %25 : vector<1x1x1x8xf32> to vector<1x8xf32>
    %27 = vector.broadcast %26 : vector<1x8xf32> to vector<8x8xf32>
    %28 = arith.addf %24, %27 : vector<8x8xf32>
    %29 = arith.truncf %14 : vector<8x8xf32> to vector<8x8xbf16>
    %30 = arith.truncf %21 : vector<8x8xf32> to vector<8x8xbf16>
    %cst_32 = arith.constant dense<0.000000e+00> : vector<8x8xf32>
    %31 = tpu.matmul %29, %30, %cst_32 {dimension_numbers = #tpu.dot_dimension_numbers<[1], [1], [0], [0], [0, 0, 1, 0], [], []>} : vector<8x8xbf16>, vector<8x8xbf16>, vector<8x8xf32> -> vector<8x8xf32>
    %32 = arith.addf %31, %6 : vector<8x8xf32>
    %cst_33 = arith.constant dense<0xFF800000> : vector<8xf32>
    %33 = vector.multi_reduction <maximumf>, %32, %cst_33 [1] : vector<8x8xf32> to vector<8xf32>
    %34 = vector.shape_cast %33 : vector<8xf32> to vector<8x1xf32>
    %35 = vector.broadcast %34 : vector<8x1xf32> to vector<8x8xf32>
    %36 = arith.subf %32, %35 : vector<8x8xf32>
    %37 = math.exp %36 : vector<8x8xf32>
    %cst_34 = arith.constant dense<0.000000e+00> : vector<8xf32>
    %38 = vector.multi_reduction <add>, %37, %cst_34 [1] : vector<8x8xf32> to vector<8xf32>
    %39 = vector.shape_cast %38 : vector<8xf32> to vector<8x1xf32>
    %40 = tpu.reciprocal %39 {approx = true} : vector<8x1xf32> -> vector<8x1xf32>
    %41 = vector.broadcast %40 : vector<8x1xf32> to vector<8x8xf32>
    %42 = arith.mulf %37, %41 : vector<8x8xf32>
    %c0_35 = arith.constant 0 : index
    %c0_36 = arith.constant 0 : index
    %c0_37 = arith.constant 0 : index
    %c0_38 = arith.constant 0 : index
    %c0_39 = arith.constant 0 : index
    %43 = vector.load %arg27[%c0_35, %c0_36, %c0_37, %c0_38, %c0_39] : memref<1x1x4x8x8xf32, #tpu.memory_space<vmem>>, vector<1x1x1x8x8xf32>
    %44 = vector.shape_cast %43 : vector<1x1x1x8x8xf32> to vector<8x8xf32>
    %45 = vector.shape_cast %42 : vector<8x8xf32> to vector<1x1x1x8x8xf32>
    tpu.vector_store %arg27[%c0_35, %c0_36, %c0_37, %c0_38, %c0_39], %45 {strides = array<i32>} : memref<1x1x4x8x8xf32, #tpu.memory_space<vmem>>, vector<1x1x1x8x8xf32>,
    %46 = arith.truncf %42 : vector<8x8xf32> to vector<8x8xbf16>
    %47 = arith.truncf %28 : vector<8x8xf32> to vector<8x8xbf16>
    %cst_40 = arith.constant dense<0.000000e+00> : vector<8x8xf32>
    %48 = tpu.matmul %46, %47, %cst_40 {dimension_numbers = #tpu.dot_dimension_numbers<[1], [0], [0], [1], [0, 0, 1, 1], [], []>} : vector<8x8xbf16>, vector<8x8xbf16>, vector<8x8xf32> -> vector<8x8xf32>
    %49 = arith.truncf %48 : vector<8x8xf32> to vector<8x8xbf16>
    %c0_41 = arith.constant 0 : index
    %c0_42 = arith.constant 0 : index
    %c0_43 = arith.constant 0 : index
    %c0_44 = arith.constant 0 : index
    %50 = vector.load %arg10[%c0_41, %c0_42, %c0_43, %c0_44] : memref<1x4x8x32xbf16, #tpu.memory_space<vmem>>, vector<1x1x8x32xbf16>
    %51 = vector.shape_cast %50 : vector<1x1x8x32xbf16> to vector<8x32xbf16>
    %cst_45 = arith.constant dense<0.000000e+00> : vector<8x32xf32>
    %52 = tpu.matmul %49, %51, %cst_45 {dimension_numbers = #tpu.dot_dimension_numbers<[1], [0], [0], [1], [0, 0, 1, 1], [], []>} : vector<8x8xbf16>, vector<8x32xbf16>, vector<8x32xf32> -> vector<8x32xf32>
    %53 = arith.addf %7, %52 : vector<8x32xf32>
    %c0_46 = arith.constant 0 : index
    %c1 = arith.constant 1 : index
    %c0_47 = arith.constant 0 : index
    %c0_48 = arith.constant 0 : index
    %54 = vector.load %arg4[%c0_46, %c1, %c0_47, %c0_48] : memref<1x4x32x8xbf16, #tpu.memory_space<vmem>>, vector<1x1x32x8xbf16>
    %55 = vector.shape_cast %54 : vector<1x1x32x8xbf16> to vector<32x8xbf16>
    %cst_49 = arith.constant dense<0.000000e+00> : vector<8x8xf32>
    %56 = tpu.matmul %4, %55, %cst_49 {dimension_numbers = #tpu.dot_dimension_numbers<[1], [0], [0], [1], [0, 0, 1, 1], [], []>} : vector<8x32xbf16>, vector<32x8xbf16>, vector<8x8xf32> -> vector<8x8xf32>
    %c0_50 = arith.constant 0 : index
    %c1_51 = arith.constant 1 : index
    %c0_52 = arith.constant 0 : index
    %c0_53 = arith.constant 0 : index
    %57 = vector.load %arg5[%c0_50, %c1_51, %c0_52, %c0_53] : memref<1x4x1x8xf32, #tpu.memory_space<vmem>>, vector<1x1x1x8xf32>
    %58 = vector.shape_cast %57 : vector<1x1x1x8xf32> to vector<1x8xf32>
    %59 = vector.broadcast %58 : vector<1x8xf32> to vector<8x8xf32>
    %60 = arith.addf %56, %59 : vector<8x8xf32>
    %c0_54 = arith.constant 0 : index
    %c1_55 = arith.constant 1 : index
    %c0_56 = arith.constant 0 : index
    %c0_57 = arith.constant 0 : index
    %61 = vector.load %arg6[%c0_54, %c1_55, %c0_56, %c0_57] : memref<1x4x32x8xbf16, #tpu.memory_space<vmem>>, vector<1x1x32x8xbf16>
    %62 = vector.shape_cast %61 : vector<1x1x32x8xbf16> to vector<32x8xbf16>
    %cst_58 = arith.constant dense<0.000000e+00> : vector<8x8xf32>
    %63 = tpu.matmul %4, %62, %cst_58 {dimension_numbers = #tpu.dot_dimension_numbers<[1], [0], [0], [1], [0, 0, 1, 1], [], []>} : vector<8x32xbf16>, vector<32x8xbf16>, vector<8x8xf32> -> vector<8x8xf32>
    %c0_59 = arith.constant 0 : index
    %c1_60 = arith.constant 1 : index
    %c0_61 = arith.constant 0 : index
    %c0_62 = arith.constant 0 : index
    %64 = vector.load %arg7[%c0_59, %c1_60, %c0_61, %c0_62] : memref<1x4x1x8xf32, #tpu.memory_space<vmem>>, vector<1x1x1x8xf32>
    %65 = vector.shape_cast %64 : vector<1x1x1x8xf32> to vector<1x8xf32>
    %66 = vector.broadcast %65 : vector<1x8xf32> to vector<8x8xf32>
    %67 = arith.addf %63, %66 : vector<8x8xf32>
    %c0_63 = arith.constant 0 : index
    %c1_64 = arith.constant 1 : index
    %c0_65 = arith.constant 0 : index
    %c0_66 = arith.constant 0 : index
    %68 = vector.load %arg8[%c0_63, %c1_64, %c0_65, %c0_66] : memref<1x4x32x8xbf16, #tpu.memory_space<vmem>>, vector<1x1x32x8xbf16>
    %69 = vector.shape_cast %68 : vector<1x1x32x8xbf16> to vector<32x8xbf16>
    %cst_67 = arith.constant dense<0.000000e+00> : vector<8x8xf32>
    %70 = tpu.matmul %4, %69, %cst_67 {dimension_numbers = #tpu.dot_dimension_numbers<[1], [0], [0], [1], [0, 0, 1, 1], [], []>} : vector<8x32xbf16>, vector<32x8xbf16>, vector<8x8xf32> -> vector<8x8xf32>
    %c0_68 = arith.constant 0 : index
    %c1_69 = arith.constant 1 : index
    %c0_70 = arith.constant 0 : index
    %c0_71 = arith.constant 0 : index
    %71 = vector.load %arg9[%c0_68, %c1_69, %c0_70, %c0_71] : memref<1x4x1x8xf32, #tpu.memory_space<vmem>>, vector<1x1x1x8xf32>
    %72 = vector.shape_cast %71 : vector<1x1x1x8xf32> to vector<1x8xf32>
    %73 = vector.broadcast %72 : vector<1x8xf32> to vector<8x8xf32>
    %74 = arith.addf %70, %73 : vector<8x8xf32>
    %75 = arith.truncf %60 : vector<8x8xf32> to vector<8x8xbf16>
    %76 = arith.truncf %67 : vector<8x8xf32> to vector<8x8xbf16>
    %cst_72 = arith.constant dense<0.000000e+00> : vector<8x8xf32>
    %77 = tpu.matmul %75, %76, %cst_72 {dimension_numbers = #tpu.dot_dimension_numbers<[1], [1], [0], [0], [0, 0, 1, 0], [], []>} : vector<8x8xbf16>, vector<8x8xbf16>, vector<8x8xf32> -> vector<8x8xf32>
    %78 = arith.addf %77, %6 : vector<8x8xf32>
    %cst_73 = arith.constant dense<0xFF800000> : vector<8xf32>
    %79 = vector.multi_reduction <maximumf>, %78, %cst_73 [1] : vector<8x8xf32> to vector<8xf32>
    %80 = vector.shape_cast %79 : vector<8xf32> to vector<8x1xf32>
    %81 = vector.broadcast %80 : vector<8x1xf32> to vector<8x8xf32>
    %82 = arith.subf %78, %81 : vector<8x8xf32>
    %83 = math.exp %82 : vector<8x8xf32>
    %cst_74 = arith.constant dense<0.000000e+00> : vector<8xf32>
    %84 = vector.multi_reduction <add>, %83, %cst_74 [1] : vector<8x8xf32> to vector<8xf32>
    %85 = vector.shape_cast %84 : vector<8xf32> to vector<8x1xf32>
    %86 = tpu.reciprocal %85 {approx = true} : vector<8x1xf32> -> vector<8x1xf32>
    %87 = vector.broadcast %86 : vector<8x1xf32> to vector<8x8xf32>
    %88 = arith.mulf %83, %87 : vector<8x8xf32>
    %c0_75 = arith.constant 0 : index
    %c0_76 = arith.constant 0 : index
    %c1_77 = arith.constant 1 : index
    %c0_78 = arith.constant 0 : index
    %c0_79 = arith.constant 0 : index
    %89 = vector.load %arg27[%c0_75, %c0_76, %c1_77, %c0_78, %c0_79] : memref<1x1x4x8x8xf32, #tpu.memory_space<vmem>>, vector<1x1x1x8x8xf32>
    %90 = vector.shape_cast %89 : vector<1x1x1x8x8xf32> to vector<8x8xf32>
    %91 = vector.shape_cast %88 : vector<8x8xf32> to vector<1x1x1x8x8xf32>
    tpu.vector_store %arg27[%c0_75, %c0_76, %c1_77, %c0_78, %c0_79], %91 {strides = array<i32>} : memref<1x1x4x8x8xf32, #tpu.memory_space<vmem>>, vector<1x1x1x8x8xf32>,
    %92 = arith.truncf %88 : vector<8x8xf32> to vector<8x8xbf16>
    %93 = arith.truncf %74 : vector<8x8xf32> to vector<8x8xbf16>
    %cst_80 = arith.constant dense<0.000000e+00> : vector<8x8xf32>
    %94 = tpu.matmul %92, %93, %cst_80 {dimension_numbers = #tpu.dot_dimension_numbers<[1], [0], [0], [1], [0, 0, 1, 1], [], []>} : vector<8x8xbf16>, vector<8x8xbf16>, vector<8x8xf32> -> vector<8x8xf32>
    %95 = arith.truncf %94 : vector<8x8xf32> to vector<8x8xbf16>
    %c0_81 = arith.constant 0 : index
    %c1_82 = arith.constant 1 : index
    %c0_83 = arith.constant 0 : index
    %c0_84 = arith.constant 0 : index
    %96 = vector.load %arg10[%c0_81, %c1_82, %c0_83, %c0_84] : memref<1x4x8x32xbf16, #tpu.memory_space<vmem>>, vector<1x1x8x32xbf16>
    %97 = vector.shape_cast %96 : vector<1x1x8x32xbf16> to vector<8x32xbf16>
    %cst_85 = arith.constant dense<0.000000e+00> : vector<8x32xf32>
    %98 = tpu.matmul %95, %97, %cst_85 {dimension_numbers = #tpu.dot_dimension_numbers<[1], [0], [0], [1], [0, 0, 1, 1], [], []>} : vector<8x8xbf16>, vector<8x32xbf16>, vector<8x32xf32> -> vector<8x32xf32>
    %99 = arith.addf %53, %98 : vector<8x32xf32>
    %c0_86 = arith.constant 0 : index
    %c2 = arith.constant 2 : index
    %c0_87 = arith.constant 0 : index
    %c0_88 = arith.constant 0 : index
    %100 = vector.load %arg4[%c0_86, %c2, %c0_87, %c0_88] : memref<1x4x32x8xbf16, #tpu.memory_space<vmem>>, vector<1x1x32x8xbf16>
    %101 = vector.shape_cast %100 : vector<1x1x32x8xbf16> to vector<32x8xbf16>
    %cst_89 = arith.constant dense<0.000000e+00> : vector<8x8xf32>
    %102 = tpu.matmul %4, %101, %cst_89 {dimension_numbers = #tpu.dot_dimension_numbers<[1], [0], [0], [1], [0, 0, 1, 1], [], []>} : vector<8x32xbf16>, vector<32x8xbf16>, vector<8x8xf32> -> vector<8x8xf32>
    %c0_90 = arith.constant 0 : index
    %c2_91 = arith.constant 2 : index
    %c0_92 = arith.constant 0 : index
    %c0_93 = arith.constant 0 : index
    %103 = vector.load %arg5[%c0_90, %c2_91, %c0_92, %c0_93] : memref<1x4x1x8xf32, #tpu.memory_space<vmem>>, vector<1x1x1x8xf32>
    %104 = vector.shape_cast %103 : vector<1x1x1x8xf32> to vector<1x8xf32>
    %105 = vector.broadcast %104 : vector<1x8xf32> to vector<8x8xf32>
    %106 = arith.addf %102, %105 : vector<8x8xf32>
    %c0_94 = arith.constant 0 : index
    %c2_95 = arith.constant 2 : index
    %c0_96 = arith.constant 0 : index
    %c0_97 = arith.constant 0 : index
    %107 = vector.load %arg6[%c0_94, %c2_95, %c0_96, %c0_97] : memref<1x4x32x8xbf16, #tpu.memory_space<vmem>>, vector<1x1x32x8xbf16>
    %108 = vector.shape_cast %107 : vector<1x1x32x8xbf16> to vector<32x8xbf16>
    %cst_98 = arith.constant dense<0.000000e+00> : vector<8x8xf32>
    %109 = tpu.matmul %4, %108, %cst_98 {dimension_numbers = #tpu.dot_dimension_numbers<[1], [0], [0], [1], [0, 0, 1, 1], [], []>} : vector<8x32xbf16>, vector<32x8xbf16>, vector<8x8xf32> -> vector<8x8xf32>
    %c0_99 = arith.constant 0 : index
    %c2_100 = arith.constant 2 : index
    %c0_101 = arith.constant 0 : index
    %c0_102 = arith.constant 0 : index
    %110 = vector.load %arg7[%c0_99, %c2_100, %c0_101, %c0_102] : memref<1x4x1x8xf32, #tpu.memory_space<vmem>>, vector<1x1x1x8xf32>
    %111 = vector.shape_cast %110 : vector<1x1x1x8xf32> to vector<1x8xf32>
    %112 = vector.broadcast %111 : vector<1x8xf32> to vector<8x8xf32>
    %113 = arith.addf %109, %112 : vector<8x8xf32>
    %c0_103 = arith.constant 0 : index
    %c2_104 = arith.constant 2 : index
    %c0_105 = arith.constant 0 : index
    %c0_106 = arith.constant 0 : index
    %114 = vector.load %arg8[%c0_103, %c2_104, %c0_105, %c0_106] : memref<1x4x32x8xbf16, #tpu.memory_space<vmem>>, vector<1x1x32x8xbf16>
    %115 = vector.shape_cast %114 : vector<1x1x32x8xbf16> to vector<32x8xbf16>
    %cst_107 = arith.constant dense<0.000000e+00> : vector<8x8xf32>
    %116 = tpu.matmul %4, %115, %cst_107 {dimension_numbers = #tpu.dot_dimension_numbers<[1], [0], [0], [1], [0, 0, 1, 1], [], []>} : vector<8x32xbf16>, vector<32x8xbf16>, vector<8x8xf32> -> vector<8x8xf32>
    %c0_108 = arith.constant 0 : index
    %c2_109 = arith.constant 2 : index
    %c0_110 = arith.constant 0 : index
    %c0_111 = arith.constant 0 : index
    %117 = vector.load %arg9[%c0_108, %c2_109, %c0_110, %c0_111] : memref<1x4x1x8xf32, #tpu.memory_space<vmem>>, vector<1x1x1x8xf32>
    %118 = vector.shape_cast %117 : vector<1x1x1x8xf32> to vector<1x8xf32>
    %119 = vector.broadcast %118 : vector<1x8xf32> to vector<8x8xf32>
    %120 = arith.addf %116, %119 : vector<8x8xf32>
    %121 = arith.truncf %106 : vector<8x8xf32> to vector<8x8xbf16>
    %122 = arith.truncf %113 : vector<8x8xf32> to vector<8x8xbf16>
    %cst_112 = arith.constant dense<0.000000e+00> : vector<8x8xf32>
    %123 = tpu.matmul %121, %122, %cst_112 {dimension_numbers = #tpu.dot_dimension_numbers<[1], [1], [0], [0], [0, 0, 1, 0], [], []>} : vector<8x8xbf16>, vector<8x8xbf16>, vector<8x8xf32> -> vector<8x8xf32>
    %124 = arith.addf %123, %6 : vector<8x8xf32>
    %cst_113 = arith.constant dense<0xFF800000> : vector<8xf32>
    %125 = vector.multi_reduction <maximumf>, %124, %cst_113 [1] : vector<8x8xf32> to vector<8xf32>
    %126 = vector.shape_cast %125 : vector<8xf32> to vector<8x1xf32>
    %127 = vector.broadcast %126 : vector<8x1xf32> to vector<8x8xf32>
    %128 = arith.subf %124, %127 : vector<8x8xf32>
    %129 = math.exp %128 : vector<8x8xf32>
    %cst_114 = arith.constant dense<0.000000e+00> : vector<8xf32>
    %130 = vector.multi_reduction <add>, %129, %cst_114 [1] : vector<8x8xf32> to vector<8xf32>
    %131 = vector.shape_cast %130 : vector<8xf32> to vector<8x1xf32>
    %132 = tpu.reciprocal %131 {approx = true} : vector<8x1xf32> -> vector<8x1xf32>
    %133 = vector.broadcast %132 : vector<8x1xf32> to vector<8x8xf32>
    %134 = arith.mulf %129, %133 : vector<8x8xf32>
    %c0_115 = arith.constant 0 : index
    %c0_116 = arith.constant 0 : index
    %c2_117 = arith.constant 2 : index
    %c0_118 = arith.constant 0 : index
    %c0_119 = arith.constant 0 : index
    %135 = vector.load %arg27[%c0_115, %c0_116, %c2_117, %c0_118, %c0_119] : memref<1x1x4x8x8xf32, #tpu.memory_space<vmem>>, vector<1x1x1x8x8xf32>
    %136 = vector.shape_cast %135 : vector<1x1x1x8x8xf32> to vector<8x8xf32>
    %137 = vector.shape_cast %134 : vector<8x8xf32> to vector<1x1x1x8x8xf32>
    tpu.vector_store %arg27[%c0_115, %c0_116, %c2_117, %c0_118, %c0_119], %137 {strides = array<i32>} : memref<1x1x4x8x8xf32, #tpu.memory_space<vmem>>, vector<1x1x1x8x8xf32>,
    %138 = arith.truncf %134 : vector<8x8xf32> to vector<8x8xbf16>
    %139 = arith.truncf %120 : vector<8x8xf32> to vector<8x8xbf16>
    %cst_120 = arith.constant dense<0.000000e+00> : vector<8x8xf32>
    %140 = tpu.matmul %138, %139, %cst_120 {dimension_numbers = #tpu.dot_dimension_numbers<[1], [0], [0], [1], [0, 0, 1, 1], [], []>} : vector<8x8xbf16>, vector<8x8xbf16>, vector<8x8xf32> -> vector<8x8xf32>
    %141 = arith.truncf %140 : vector<8x8xf32> to vector<8x8xbf16>
    %c0_121 = arith.constant 0 : index
    %c2_122 = arith.constant 2 : index
    %c0_123 = arith.constant 0 : index
    %c0_124 = arith.constant 0 : index
    %142 = vector.load %arg10[%c0_121, %c2_122, %c0_123, %c0_124] : memref<1x4x8x32xbf16, #tpu.memory_space<vmem>>, vector<1x1x8x32xbf16>
    %143 = vector.shape_cast %142 : vector<1x1x8x32xbf16> to vector<8x32xbf16>
    %cst_125 = arith.constant dense<0.000000e+00> : vector<8x32xf32>
    %144 = tpu.matmul %141, %143, %cst_125 {dimension_numbers = #tpu.dot_dimension_numbers<[1], [0], [0], [1], [0, 0, 1, 1], [], []>} : vector<8x8xbf16>, vector<8x32xbf16>, vector<8x32xf32> -> vector<8x32xf32>
    %145 = arith.addf %99, %144 : vector<8x32xf32>
    %c0_126 = arith.constant 0 : index
    %c3 = arith.constant 3 : index
    %c0_127 = arith.constant 0 : index
    %c0_128 = arith.constant 0 : index
    %146 = vector.load %arg4[%c0_126, %c3, %c0_127, %c0_128] : memref<1x4x32x8xbf16, #tpu.memory_space<vmem>>, vector<1x1x32x8xbf16>
    %147 = vector.shape_cast %146 : vector<1x1x32x8xbf16> to vector<32x8xbf16>
    %cst_129 = arith.constant dense<0.000000e+00> : vector<8x8xf32>
    %148 = tpu.matmul %4, %147, %cst_129 {dimension_numbers = #tpu.dot_dimension_numbers<[1], [0], [0], [1], [0, 0, 1, 1], [], []>} : vector<8x32xbf16>, vector<32x8xbf16>, vector<8x8xf32> -> vector<8x8xf32>
    %c0_130 = arith.constant 0 : index
    %c3_131 = arith.constant 3 : index
    %c0_132 = arith.constant 0 : index
    %c0_133 = arith.constant 0 : index
    %149 = vector.load %arg5[%c0_130, %c3_131, %c0_132, %c0_133] : memref<1x4x1x8xf32, #tpu.memory_space<vmem>>, vector<1x1x1x8xf32>
    %150 = vector.shape_cast %149 : vector<1x1x1x8xf32> to vector<1x8xf32>
    %151 = vector.broadcast %150 : vector<1x8xf32> to vector<8x8xf32>
    %152 = arith.addf %148, %151 : vector<8x8xf32>
    %c0_134 = arith.constant 0 : index
    %c3_135 = arith.constant 3 : index
    %c0_136 = arith.constant 0 : index
    %c0_137 = arith.constant 0 : index
    %153 = vector.load %arg6[%c0_134, %c3_135, %c0_136, %c0_137] : memref<1x4x32x8xbf16, #tpu.memory_space<vmem>>, vector<1x1x32x8xbf16>
    %154 = vector.shape_cast %153 : vector<1x1x32x8xbf16> to vector<32x8xbf16>
    %cst_138 = arith.constant dense<0.000000e+00> : vector<8x8xf32>
    %155 = tpu.matmul %4, %154, %cst_138 {dimension_numbers = #tpu.dot_dimension_numbers<[1], [0], [0], [1], [0, 0, 1, 1], [], []>} : vector<8x32xbf16>, vector<32x8xbf16>, vector<8x8xf32> -> vector<8x8xf32>
    %c0_139 = arith.constant 0 : index
    %c3_140 = arith.constant 3 : index
    %c0_141 = arith.constant 0 : index
    %c0_142 = arith.constant 0 : index
    %156 = vector.load %arg7[%c0_139, %c3_140, %c0_141, %c0_142] : memref<1x4x1x8xf32, #tpu.memory_space<vmem>>, vector<1x1x1x8xf32>
    %157 = vector.shape_cast %156 : vector<1x1x1x8xf32> to vector<1x8xf32>
    %158 = vector.broadcast %157 : vector<1x8xf32> to vector<8x8xf32>
    %159 = arith.addf %155, %158 : vector<8x8xf32>
    %c0_143 = arith.constant 0 : index
    %c3_144 = arith.constant 3 : index
    %c0_145 = arith.constant 0 : index
    %c0_146 = arith.constant 0 : index
    %160 = vector.load %arg8[%c0_143, %c3_144, %c0_145, %c0_146] : memref<1x4x32x8xbf16, #tpu.memory_space<vmem>>, vector<1x1x32x8xbf16>
    %161 = vector.shape_cast %160 : vector<1x1x32x8xbf16> to vector<32x8xbf16>
    %cst_147 = arith.constant dense<0.000000e+00> : vector<8x8xf32>
    %162 = tpu.matmul %4, %161, %cst_147 {dimension_numbers = #tpu.dot_dimension_numbers<[1], [0], [0], [1], [0, 0, 1, 1], [], []>} : vector<8x32xbf16>, vector<32x8xbf16>, vector<8x8xf32> -> vector<8x8xf32>
    %c0_148 = arith.constant 0 : index
    %c3_149 = arith.constant 3 : index
    %c0_150 = arith.constant 0 : index
    %c0_151 = arith.constant 0 : index
    %163 = vector.load %arg9[%c0_148, %c3_149, %c0_150, %c0_151] : memref<1x4x1x8xf32, #tpu.memory_space<vmem>>, vector<1x1x1x8xf32>
    %164 = vector.shape_cast %163 : vector<1x1x1x8xf32> to vector<1x8xf32>
    %165 = vector.broadcast %164 : vector<1x8xf32> to vector<8x8xf32>
    %166 = arith.addf %162, %165 : vector<8x8xf32>
    %167 = arith.truncf %152 : vector<8x8xf32> to vector<8x8xbf16>
    %168 = arith.truncf %159 : vector<8x8xf32> to vector<8x8xbf16>
    %cst_152 = arith.constant dense<0.000000e+00> : vector<8x8xf32>
    %169 = tpu.matmul %167, %168, %cst_152 {dimension_numbers = #tpu.dot_dimension_numbers<[1], [1], [0], [0], [0, 0, 1, 0], [], []>} : vector<8x8xbf16>, vector<8x8xbf16>, vector<8x8xf32> -> vector<8x8xf32>
    %170 = arith.addf %169, %6 : vector<8x8xf32>
    %cst_153 = arith.constant dense<0xFF800000> : vector<8xf32>
    %171 = vector.multi_reduction <maximumf>, %170, %cst_153 [1] : vector<8x8xf32> to vector<8xf32>
    %172 = vector.shape_cast %171 : vector<8xf32> to vector<8x1xf32>
    %173 = vector.broadcast %172 : vector<8x1xf32> to vector<8x8xf32>
    %174 = arith.subf %170, %173 : vector<8x8xf32>
    %175 = math.exp %174 : vector<8x8xf32>
    %cst_154 = arith.constant dense<0.000000e+00> : vector<8xf32>
    %176 = vector.multi_reduction <add>, %175, %cst_154 [1] : vector<8x8xf32> to vector<8xf32>
    %177 = vector.shape_cast %176 : vector<8xf32> to vector<8x1xf32>
    %178 = tpu.reciprocal %177 {approx = true} : vector<8x1xf32> -> vector<8x1xf32>
    %179 = vector.broadcast %178 : vector<8x1xf32> to vector<8x8xf32>
    %180 = arith.mulf %175, %179 : vector<8x8xf32>
    %c0_155 = arith.constant 0 : index
    %c0_156 = arith.constant 0 : index
    %c3_157 = arith.constant 3 : index
    %c0_158 = arith.constant 0 : index
    %c0_159 = arith.constant 0 : index
    %181 = vector.load %arg27[%c0_155, %c0_156, %c3_157, %c0_158, %c0_159] : memref<1x1x4x8x8xf32, #tpu.memory_space<vmem>>, vector<1x1x1x8x8xf32>
    %182 = vector.shape_cast %181 : vector<1x1x1x8x8xf32> to vector<8x8xf32>
    %183 = vector.shape_cast %180 : vector<8x8xf32> to vector<1x1x1x8x8xf32>
    tpu.vector_store %arg27[%c0_155, %c0_156, %c3_157, %c0_158, %c0_159], %183 {strides = array<i32>} : memref<1x1x4x8x8xf32, #tpu.memory_space<vmem>>, vector<1x1x1x8x8xf32>,
    %184 = arith.truncf %180 : vector<8x8xf32> to vector<8x8xbf16>
    %185 = arith.truncf %166 : vector<8x8xf32> to vector<8x8xbf16>
    %cst_160 = arith.constant dense<0.000000e+00> : vector<8x8xf32>
    %186 = tpu.matmul %184, %185, %cst_160 {dimension_numbers = #tpu.dot_dimension_numbers<[1], [0], [0], [1], [0, 0, 1, 1], [], []>} : vector<8x8xbf16>, vector<8x8xbf16>, vector<8x8xf32> -> vector<8x8xf32>
    %187 = arith.truncf %186 : vector<8x8xf32> to vector<8x8xbf16>
    %c0_161 = arith.constant 0 : index
    %c3_162 = arith.constant 3 : index
    %c0_163 = arith.constant 0 : index
    %c0_164 = arith.constant 0 : index
    %188 = vector.load %arg10[%c0_161, %c3_162, %c0_163, %c0_164] : memref<1x4x8x32xbf16, #tpu.memory_space<vmem>>, vector<1x1x8x32xbf16>
    %189 = vector.shape_cast %188 : vector<1x1x8x32xbf16> to vector<8x32xbf16>
    %cst_165 = arith.constant dense<0.000000e+00> : vector<8x32xf32>
    %190 = tpu.matmul %187, %189, %cst_165 {dimension_numbers = #tpu.dot_dimension_numbers<[1], [0], [0], [1], [0, 0, 1, 1], [], []>} : vector<8x8xbf16>, vector<8x32xbf16>, vector<8x32xf32> -> vector<8x32xf32>
    %191 = arith.addf %145, %190 : vector<8x32xf32>
    %192 = arith.addf %3, %191 : vector<8x32xf32>
    %c0_166 = arith.constant 0 : index
    %c0_167 = arith.constant 0 : index
    %c0_168 = arith.constant 0 : index
    %193 = vector.load %arg11[%c0_166, %c0_167, %c0_168] : memref<1x1x32xf32, #tpu.memory_space<vmem>>, vector<1x1x32xf32>
    %194 = vector.shape_cast %193 : vector<1x1x32xf32> to vector<1x32xf32>
    %195 = vector.broadcast %194 : vector<1x32xf32> to vector<8x32xf32>
    %196 = arith.addf %192, %195 : vector<8x32xf32>
    %c0_169 = arith.constant 0 : index
    %c0_170 = arith.constant 0 : index
    %c0_171 = arith.constant 0 : index
    %197 = vector.load %arg12[%c0_169, %c0_170, %c0_171] : memref<1x1x32xf32, #tpu.memory_space<vmem>>, vector<1x1x32xf32>
    %198 = vector.shape_cast %197 : vector<1x1x32xf32> to vector<1x32xf32>
    %c0_172 = arith.constant 0 : index
    %c0_173 = arith.constant 0 : index
    %c0_174 = arith.constant 0 : index
    %199 = vector.load %arg13[%c0_172, %c0_173, %c0_174] : memref<1x1x32xf32, #tpu.memory_space<vmem>>, vector<1x1x32xf32>
    %200 = vector.shape_cast %199 : vector<1x1x32xf32> to vector<1x32xf32>
    %cst_175 = arith.constant dense<0.000000e+00> : vector<8xf32>
    %201 = vector.multi_reduction <add>, %196, %cst_175 [1] : vector<8x32xf32> to vector<8xf32>
    %202 = vector.shape_cast %201 : vector<8xf32> to vector<8x1xf32>
    %cst_176 = arith.constant 3.200000e+01 : f32
    %203 = vector.broadcast %cst_176 : f32 to vector<8x1xf32>
    %204 = arith.divf %202, %203 : vector<8x1xf32>
    %205 = vector.broadcast %204 : vector<8x1xf32> to vector<8x32xf32>
    %206 = arith.subf %196, %205 : vector<8x32xf32>
    %207 = arith.mulf %206, %206 : vector<8x32xf32>
    %cst_177 = arith.constant dense<0.000000e+00> : vector<8xf32>
    %208 = vector.multi_reduction <add>, %207, %cst_177 [1] : vector<8x32xf32> to vector<8xf32>
    %209 = vector.shape_cast %208 : vector<8xf32> to vector<8x1xf32>
    %cst_178 = arith.constant 3.200000e+01 : f32
    %210 = vector.broadcast %cst_178 : f32 to vector<8x1xf32>
    %211 = arith.divf %209, %210 : vector<8x1xf32>
    %212 = vector.broadcast %204 : vector<8x1xf32> to vector<8x32xf32>
    %213 = arith.subf %196, %212 : vector<8x32xf32>
    %cst_179 = arith.constant 9.99999974E-6 : f32
    %214 = vector.broadcast %cst_179 : f32 to vector<8x1xf32>
    %215 = arith.addf %211, %214 : vector<8x1xf32>
    %216 = math.rsqrt %215 : vector<8x1xf32>
    %217 = vector.broadcast %216 : vector<8x1xf32> to vector<8x32xf32>
    %218 = arith.mulf %213, %217 : vector<8x32xf32>
    %219 = vector.broadcast %198 : vector<1x32xf32> to vector<8x32xf32>
    %220 = arith.mulf %218, %219 : vector<8x32xf32>
    %221 = vector.broadcast %200 : vector<1x32xf32> to vector<8x32xf32>
    %222 = arith.addf %220, %221 : vector<8x32xf32>
    %223 = arith.truncf %222 : vector<8x32xf32> to vector<8x32xbf16>
    %c0_180 = arith.constant 0 : index
    %c0_181 = arith.constant 0 : index
    %c0_182 = arith.constant 0 : index
    %224 = vector.load %arg14[%c0_180, %c0_181, %c0_182] : memref<1x32x64xbf16, #tpu.memory_space<vmem>>, vector<1x32x64xbf16>
    %225 = vector.shape_cast %224 : vector<1x32x64xbf16> to vector<32x64xbf16>
    %cst_183 = arith.constant dense<0.000000e+00> : vector<8x64xf32>
    %226 = tpu.matmul %223, %225, %cst_183 {dimension_numbers = #tpu.dot_dimension_numbers<[1], [0], [0], [1], [0, 0, 1, 1], [], []>} : vector<8x32xbf16>, vector<32x64xbf16>, vector<8x64xf32> -> vector<8x64xf32>
    %c0_184 = arith.constant 0 : index
    %c0_185 = arith.constant 0 : index
    %c0_186 = arith.constant 0 : index
    %227 = vector.load %arg15[%c0_184, %c0_185, %c0_186] : memref<1x1x64xf32, #tpu.memory_space<vmem>>, vector<1x1x64xf32>
    %228 = vector.shape_cast %227 : vector<1x1x64xf32> to vector<1x64xf32>
    %229 = vector.broadcast %228 : vector<1x64xf32> to vector<8x64xf32>
    %230 = arith.addf %226, %229 : vector<8x64xf32>
    %231 = arith.mulf %230, %230 : vector<8x64xf32>
    %232 = arith.mulf %230, %231 : vector<8x64xf32>
    %cst_187 = arith.constant 4.471500e-02 : f32
    %233 = vector.broadcast %cst_187 : f32 to vector<8x64xf32>
    %234 = arith.mulf %233, %232 : vector<8x64xf32>
    %235 = arith.addf %230, %234 : vector<8x64xf32>
    %cst_188 = arith.constant 0.797884583 : f32
    %236 = vector.broadcast %cst_188 : f32 to vector<8x64xf32>
    %237 = arith.mulf %236, %235 : vector<8x64xf32>
    %238 = math.tanh %237 : vector<8x64xf32>
    %cst_189 = arith.constant 1.000000e+00 : f32
    %239 = vector.broadcast %cst_189 : f32 to vector<8x64xf32>
    %240 = arith.addf %239, %238 : vector<8x64xf32>
    %cst_190 = arith.constant 5.000000e-01 : f32
    %241 = vector.broadcast %cst_190 : f32 to vector<8x64xf32>
    %242 = arith.mulf %241, %240 : vector<8x64xf32>
    %243 = arith.mulf %230, %242 : vector<8x64xf32>
    %244 = arith.truncf %243 : vector<8x64xf32> to vector<8x64xbf16>
    %c0_191 = arith.constant 0 : index
    %c0_192 = arith.constant 0 : index
    %c0_193 = arith.constant 0 : index
    %245 = vector.load %arg16[%c0_191, %c0_192, %c0_193] : memref<1x64x32xbf16, #tpu.memory_space<vmem>>, vector<1x64x32xbf16>
    %246 = vector.shape_cast %245 : vector<1x64x32xbf16> to vector<64x32xbf16>
    %cst_194 = arith.constant dense<0.000000e+00> : vector<8x32xf32>
    %247 = tpu.matmul %244, %246, %cst_194 {dimension_numbers = #tpu.dot_dimension_numbers<[1], [0], [0], [1], [0, 0, 1, 1], [], []>} : vector<8x64xbf16>, vector<64x32xbf16>, vector<8x32xf32> -> vector<8x32xf32>
    %c0_195 = arith.constant 0 : index
    %c0_196 = arith.constant 0 : index
    %c0_197 = arith.constant 0 : index
    %248 = vector.load %arg17[%c0_195, %c0_196, %c0_197] : memref<1x1x32xf32, #tpu.memory_space<vmem>>, vector<1x1x32xf32>
    %249 = vector.shape_cast %248 : vector<1x1x32xf32> to vector<1x32xf32>
    %250 = vector.broadcast %249 : vector<1x32xf32> to vector<8x32xf32>
    %251 = arith.addf %247, %250 : vector<8x32xf32>
    %252 = arith.addf %222, %251 : vector<8x32xf32>
    %c0_198 = arith.constant 0 : index
    %c0_199 = arith.constant 0 : index
    %c0_200 = arith.constant 0 : index
    %253 = vector.load %arg18[%c0_198, %c0_199, %c0_200] : memref<1x1x32xf32, #tpu.memory_space<vmem>>, vector<1x1x32xf32>
    %254 = vector.shape_cast %253 : vector<1x1x32xf32> to vector<1x32xf32>
    %c0_201 = arith.constant 0 : index
    %c0_202 = arith.constant 0 : index
    %c0_203 = arith.constant 0 : index
    %255 = vector.load %arg19[%c0_201, %c0_202, %c0_203] : memref<1x1x32xf32, #tpu.memory_space<vmem>>, vector<1x1x32xf32>
    %256 = vector.shape_cast %255 : vector<1x1x32xf32> to vector<1x32xf32>
    %cst_204 = arith.constant dense<0.000000e+00> : vector<8xf32>
    %257 = vector.multi_reduction <add>, %252, %cst_204 [1] : vector<8x32xf32> to vector<8xf32>
    %258 = vector.shape_cast %257 : vector<8xf32> to vector<8x1xf32>
    %cst_205 = arith.constant 3.200000e+01 : f32
    %259 = vector.broadcast %cst_205 : f32 to vector<8x1xf32>
    %260 = arith.divf %258, %259 : vector<8x1xf32>
    %261 = vector.broadcast %260 : vector<8x1xf32> to vector<8x32xf32>
    %262 = arith.subf %252, %261 : vector<8x32xf32>
    %263 = arith.mulf %262, %262 : vector<8x32xf32>
    %cst_206 = arith.constant dense<0.000000e+00> : vector<8xf32>
    %264 = vector.multi_reduction <add>, %263, %cst_206 [1] : vector<8x32xf32> to vector<8xf32>
    %265 = vector.shape_cast %264 : vector<8xf32> to vector<8x1xf32>
    %cst_207 = arith.constant 3.200000e+01 : f32
    %266 = vector.broadcast %cst_207 : f32 to vector<8x1xf32>
    %267 = arith.divf %265, %266 : vector<8x1xf32>
    %268 = vector.broadcast %260 : vector<8x1xf32> to vector<8x32xf32>
    %269 = arith.subf %252, %268 : vector<8x32xf32>
    %cst_208 = arith.constant 9.99999974E-6 : f32
    %270 = vector.broadcast %cst_208 : f32 to vector<8x1xf32>
    %271 = arith.addf %267, %270 : vector<8x1xf32>
    %272 = math.rsqrt %271 : vector<8x1xf32>
    %273 = vector.broadcast %272 : vector<8x1xf32> to vector<8x32xf32>
    %274 = arith.mulf %269, %273 : vector<8x32xf32>
    %275 = vector.broadcast %254 : vector<1x32xf32> to vector<8x32xf32>
    %276 = arith.mulf %274, %275 : vector<8x32xf32>
    %277 = vector.broadcast %256 : vector<1x32xf32> to vector<8x32xf32>
    %278 = arith.addf %276, %277 : vector<8x32xf32>
    %c0_209 = arith.constant 0 : index
    %c0_210 = arith.constant 0 : index
    %279 = vector.load %arg28[%c0_209, %c0_210] : memref<8x32xf32, #tpu.memory_space<vmem>>, vector<8x32xf32>
    tpu.vector_store %arg28[%c0_209, %c0_210], %278 {strides = array<i32>} : memref<8x32xf32, #tpu.memory_space<vmem>>, vector<8x32xf32>,
    %c1_i32 = arith.constant 1 : i32
    %280 = arith.cmpi eq, %arg1, %c1_i32 : i32
    %281 = arith.extui %280 : i1 to i32
    %c0_i32_211 = arith.constant 0 : i32
    %282 = arith.cmpi ne, %281, %c0_i32_211 : i32
    scf.if %282 {
      %283 = arith.truncf %278 : vector<8x32xf32> to vector<8x32xbf16>
      %c0_212 = arith.constant 0 : index
      %c0_213 = arith.constant 0 : index
      %284 = vector.load %arg20[%c0_212, %c0_213] : memref<32x32xbf16, #tpu.memory_space<vmem>>, vector<32x32xbf16>
      %cst_214 = arith.constant dense<0.000000e+00> : vector<8x32xf32>
      %285 = tpu.matmul %283, %284, %cst_214 {dimension_numbers = #tpu.dot_dimension_numbers<[1], [0], [0], [1], [0, 0, 1, 1], [], []>} : vector<8x32xbf16>, vector<32x32xbf16>, vector<8x32xf32> -> vector<8x32xf32>
      %c0_215 = arith.constant 0 : index
      %c0_216 = arith.constant 0 : index
      %286 = vector.load %arg21[%c0_215, %c0_216] : memref<1x32xf32, #tpu.memory_space<vmem>>, vector<1x32xf32>
      %287 = vector.broadcast %286 : vector<1x32xf32> to vector<8x32xf32>
      %288 = arith.addf %285, %287 : vector<8x32xf32>
      %289 = math.tanh %288 : vector<8x32xf32>
      %290 = arith.truncf %289 : vector<8x32xf32> to vector<8x32xbf16>
      %c0_217 = arith.constant 0 : index
      %c0_218 = arith.constant 0 : index
      %291 = vector.load %arg22[%c0_217, %c0_218] : memref<32x64xbf16, #tpu.memory_space<vmem>>, vector<32x64xbf16>
      %cst_219 = arith.constant dense<0.000000e+00> : vector<8x64xf32>
      %292 = tpu.matmul %290, %291, %cst_219 {dimension_numbers = #tpu.dot_dimension_numbers<[1], [0], [0], [1], [0, 0, 1, 1], [], []>} : vector<8x32xbf16>, vector<32x64xbf16>, vector<8x64xf32> -> vector<8x64xf32>
      %c0_220 = arith.constant 0 : index
      %c0_221 = arith.constant 0 : index
      %293 = vector.load %arg23[%c0_220, %c0_221] : memref<1x64xf32, #tpu.memory_space<vmem>>, vector<1x64xf32>
      %294 = vector.broadcast %293 : vector<1x64xf32> to vector<8x64xf32>
      %295 = arith.addf %292, %294 : vector<8x64xf32>
      %cst_222 = arith.constant 0.000000e+00 : f32
      %296 = vector.broadcast %cst_222 : f32 to vector<8x64xf32>
      %297 = arith.maximumf %295, %296 : vector<8x64xf32>
      %298 = arith.truncf %297 : vector<8x64xf32> to vector<8x64xbf16>
      %c0_223 = arith.constant 0 : index
      %c0_224 = arith.constant 0 : index
      %299 = vector.load %arg24[%c0_223, %c0_224] : memref<64x3xbf16, #tpu.memory_space<vmem>>, vector<64x3xbf16>
      %cst_225 = arith.constant dense<0.000000e+00> : vector<8x3xf32>
      %300 = tpu.matmul %298, %299, %cst_225 {dimension_numbers = #tpu.dot_dimension_numbers<[1], [0], [0], [1], [0, 0, 1, 1], [], []>} : vector<8x64xbf16>, vector<64x3xbf16>, vector<8x3xf32> -> vector<8x3xf32>
      %c0_226 = arith.constant 0 : index
      %c0_227 = arith.constant 0 : index
      %301 = vector.load %arg25[%c0_226, %c0_227] : memref<1x3xf32, #tpu.memory_space<vmem>>, vector<1x3xf32>
      %302 = vector.broadcast %301 : vector<1x3xf32> to vector<8x3xf32>
      %303 = arith.addf %300, %302 : vector<8x3xf32>
      %c0_228 = arith.constant 0 : index
      %c0_229 = arith.constant 0 : index
      %c0_230 = arith.constant 0 : index
      %304 = vector.load %arg26[%c0_228, %c0_229, %c0_230] : memref<1x8x3xf32, #tpu.memory_space<vmem>>, vector<1x8x3xf32>
      %305 = vector.shape_cast %304 : vector<1x8x3xf32> to vector<8x3xf32>
      %306 = vector.shape_cast %303 : vector<8x3xf32> to vector<1x8x3xf32>
      tpu.vector_store %arg26[%c0_228, %c0_229, %c0_230], %306 {strides = array<i32>} : memref<1x8x3xf32, #tpu.memory_space<vmem>>, vector<1x8x3xf32>,
    } else {
    }
    return
  }
  func.func @transform_0(%arg0: i32, %arg1: i32) -> (i32, i32, i32) {
    %c0_i32 = arith.constant 0 : i32
    %c0_i32_0 = arith.constant 0 : i32
    %c0_i32_1 = arith.constant 0 : i32
    return %arg0, %c0_i32, %c0_i32_0 : i32, i32, i32
  }
  func.func @transform_1(%arg0: i32, %arg1: i32) -> (i32, i32, i32) {
    %c0_i32 = arith.constant 0 : i32
    %c0_i32_0 = arith.constant 0 : i32
    %c0_i32_1 = arith.constant 0 : i32
    return %arg0, %c0_i32, %c0_i32_0 : i32, i32, i32
  }
  func.func @transform_2(%arg0: i32, %arg1: i32) -> (i32, i32, i32, i32) {
    %c0_i32 = arith.constant 0 : i32
    %c0_i32_0 = arith.constant 0 : i32
    %c0_i32_1 = arith.constant 0 : i32
    %c0_i32_2 = arith.constant 0 : i32
    return %arg1, %c0_i32, %c0_i32_0, %c0_i32_1 : i32, i32, i32, i32
  }
  func.func @transform_3(%arg0: i32, %arg1: i32) -> (i32, i32, i32, i32) {
    %c0_i32 = arith.constant 0 : i32
    %c0_i32_0 = arith.constant 0 : i32
    %c0_i32_1 = arith.constant 0 : i32
    %c0_i32_2 = arith.constant 0 : i32
    return %arg1, %c0_i32, %c0_i32_0, %c0_i32_1 : i32, i32, i32, i32
  }
  func.func @transform_4(%arg0: i32, %arg1: i32) -> (i32, i32, i32, i32) {
    %c0_i32 = arith.constant 0 : i32
    %c0_i32_0 = arith.constant 0 : i32
    %c0_i32_1 = arith.constant 0 : i32
    %c0_i32_2 = arith.constant 0 : i32
    return %arg1, %c0_i32, %c0_i32_0, %c0_i32_1 : i32, i32, i32, i32
  }
  func.func @transform_5(%arg0: i32, %arg1: i32) -> (i32, i32, i32, i32) {
    %c0_i32 = arith.constant 0 : i32
    %c0_i32_0 = arith.constant 0 : i32
    %c0_i32_1 = arith.constant 0 : i32
    %c0_i32_2 = arith.constant 0 : i32
    return %arg1, %c0_i32, %c0_i32_0, %c0_i32_1 : i32, i32, i32, i32
  }
  func.func @transform_6(%arg0: i32, %arg1: i32) -> (i32, i32, i32, i32) {
    %c0_i32 = arith.constant 0 : i32
    %c0_i32_0 = arith.constant 0 : i32
    %c0_i32_1 = arith.constant 0 : i32
    %c0_i32_2 = arith.constant 0 : i32
    return %arg1, %c0_i32, %c0_i32_0, %c0_i32_1 : i32, i32, i32, i32
  }
  func.func @transform_7(%arg0: i32, %arg1: i32) -> (i32, i32, i32, i32) {
    %c0_i32 = arith.constant 0 : i32
    %c0_i32_0 = arith.constant 0 : i32
    %c0_i32_1 = arith.constant 0 : i32
    %c0_i32_2 = arith.constant 0 : i32
    return %arg1, %c0_i32, %c0_i32_0, %c0_i32_1 : i32, i32, i32, i32
  }
  func.func @transform_8(%arg0: i32, %arg1: i32) -> (i32, i32, i32, i32) {
    %c0_i32 = arith.constant 0 : i32
    %c0_i32_0 = arith.constant 0 : i32
    %c0_i32_1 = arith.constant 0 : i32
    %c0_i32_2 = arith.constant 0 : i32
    return %arg1, %c0_i32, %c0_i32_0, %c0_i32_1 : i32, i32, i32, i32
  }
  func.func @transform_9(%arg0: i32, %arg1: i32) -> (i32, i32, i32) {
    %c0_i32 = arith.constant 0 : i32
    %c0_i32_0 = arith.constant 0 : i32
    %c0_i32_1 = arith.constant 0 : i32
    return %arg1, %c0_i32, %c0_i32_0 : i32, i32, i32
  }
  func.func @transform_10(%arg0: i32, %arg1: i32) -> (i32, i32, i32) {
    %c0_i32 = arith.constant 0 : i32
    %c0_i32_0 = arith.constant 0 : i32
    %c0_i32_1 = arith.constant 0 : i32
    return %arg1, %c0_i32, %c0_i32_0 : i32, i32, i32
  }
  func.func @transform_11(%arg0: i32, %arg1: i32) -> (i32, i32, i32) {
    %c0_i32 = arith.constant 0 : i32
    %c0_i32_0 = arith.constant 0 : i32
    %c0_i32_1 = arith.constant 0 : i32
    return %arg1, %c0_i32, %c0_i32_0 : i32, i32, i32
  }
  func.func @transform_12(%arg0: i32, %arg1: i32) -> (i32, i32, i32) {
    %c0_i32 = arith.constant 0 : i32
    %c0_i32_0 = arith.constant 0 : i32
    %c0_i32_1 = arith.constant 0 : i32
    return %arg1, %c0_i32, %c0_i32_0 : i32, i32, i32
  }
  func.func @transform_13(%arg0: i32, %arg1: i32) -> (i32, i32, i32) {
    %c0_i32 = arith.constant 0 : i32
    %c0_i32_0 = arith.constant 0 : i32
    %c0_i32_1 = arith.constant 0 : i32
    return %arg1, %c0_i32, %c0_i32_0 : i32, i32, i32
  }
  func.func @transform_14(%arg0: i32, %arg1: i32) -> (i32, i32, i32) {
    %c0_i32 = arith.constant 0 : i32
    %c0_i32_0 = arith.constant 0 : i32
    %c0_i32_1 = arith.constant 0 : i32
    return %arg1, %c0_i32, %c0_i32_0 : i32, i32, i32
  }
  func.func @transform_15(%arg0: i32, %arg1: i32) -> (i32, i32, i32) {
    %c0_i32 = arith.constant 0 : i32
    %c0_i32_0 = arith.constant 0 : i32
    %c0_i32_1 = arith.constant 0 : i32
    return %arg1, %c0_i32, %c0_i32_0 : i32, i32, i32
  }
  func.func @transform_16(%arg0: i32, %arg1: i32) -> (i32, i32, i32) {
    %c0_i32 = arith.constant 0 : i32
    %c0_i32_0 = arith.constant 0 : i32
    %c0_i32_1 = arith.constant 0 : i32
    return %arg1, %c0_i32, %c0_i32_0 : i32, i32, i32
  }
  func.func @transform_17(%arg0: i32, %arg1: i32) -> (i32, i32, i32) {
    %c0_i32 = arith.constant 0 : i32
    %c0_i32_0 = arith.constant 0 : i32
    %c0_i32_1 = arith.constant 0 : i32
    return %arg1, %c0_i32, %c0_i32_0 : i32, i32, i32
  }
  func.func @transform_18(%arg0: i32, %arg1: i32) -> (i32, i32) {
    %c0_i32 = arith.constant 0 : i32
    %c0_i32_0 = arith.constant 0 : i32
    %c0_i32_1 = arith.constant 0 : i32
    return %c0_i32, %c0_i32_0 : i32, i32
  }
  func.func @transform_19(%arg0: i32, %arg1: i32) -> (i32, i32) {
    %c0_i32 = arith.constant 0 : i32
    %c0_i32_0 = arith.constant 0 : i32
    %c0_i32_1 = arith.constant 0 : i32
    return %c0_i32, %c0_i32_0 : i32, i32
  }
  func.func @transform_20(%arg0: i32, %arg1: i32) -> (i32, i32) {
    %c0_i32 = arith.constant 0 : i32
    %c0_i32_0 = arith.constant 0 : i32
    %c0_i32_1 = arith.constant 0 : i32
    return %c0_i32, %c0_i32_0 : i32, i32
  }
  func.func @transform_21(%arg0: i32, %arg1: i32) -> (i32, i32) {
    %c0_i32 = arith.constant 0 : i32
    %c0_i32_0 = arith.constant 0 : i32
    %c0_i32_1 = arith.constant 0 : i32
    return %c0_i32, %c0_i32_0 : i32, i32
  }
  func.func @transform_22(%arg0: i32, %arg1: i32) -> (i32, i32) {
    %c0_i32 = arith.constant 0 : i32
    %c0_i32_0 = arith.constant 0 : i32
    %c0_i32_1 = arith.constant 0 : i32
    return %c0_i32, %c0_i32_0 : i32, i32
  }
  func.func @transform_23(%arg0: i32, %arg1: i32) -> (i32, i32) {
    %c0_i32 = arith.constant 0 : i32
    %c0_i32_0 = arith.constant 0 : i32
    %c0_i32_1 = arith.constant 0 : i32
    return %c0_i32, %c0_i32_0 : i32, i32
  }
  func.func @transform_24(%arg0: i32, %arg1: i32) -> (i32, i32, i32) {
    %c0_i32 = arith.constant 0 : i32
    %c0_i32_0 = arith.constant 0 : i32
    %c0_i32_1 = arith.constant 0 : i32
    return %arg0, %c0_i32, %c0_i32_0 : i32, i32, i32
  }
  func.func @transform_25(%arg0: i32, %arg1: i32) -> (i32, i32, i32, i32, i32) {
    %c0_i32 = arith.constant 0 : i32
    %c0_i32_0 = arith.constant 0 : i32
    %c0_i32_1 = arith.constant 0 : i32
    %c0_i32_2 = arith.constant 0 : i32
    return %arg1, %arg0, %c0_i32, %c0_i32_0, %c0_i32_1 : i32, i32, i32, i32, i32
  }
}

</mosaic_0001>

<bundles_post_ra>
// kernel: bertweet_forward.1
= control target key start
LH: loop header
LB: loop body
LE: loop exit
PB: predicated region body
PF: predicated region fallthrough
CT: control target
= control target key end

     0   :  { %s4010_s29 = smov 0   ;;  %s4016_s30 = smov 0   ;;  %s4479_s0 = inlined_call_operand.vmem [shape: f32[2,8,32], index: 0, kind: input, shape index: {}]   ;;  %s4480_s1 = inlined_call_operand.vmem [shape: f32[2,8,8], index: 1, kind: input, shape index: {}]   ;;  %s4481_s2 = inlined_call_operand.vmem [shape: bf16[2,4,32,8], index: 2, kind: input, shape index: {}]   ;;  %s4482_s3 = inlined_call_operand.vmem [shape: f32[2,4,1,8], index: 3, kind: input, shape index: {}]   ;;  %s4483_s4 = inlined_call_operand.vmem [shape: bf16[2,4,32,8], index: 4, kind: input, shape index: {}]   ;;  %s4484_s5 = inlined_call_operand.vmem [shape: f32[2,4,1,8], index: 5, kind: input, shape index: {}]   ;;  %s4485_s6 = inlined_call_operand.vmem [shape: bf16[2,4,32,8], index: 6, kind: input, shape index: {}]   ;;  %s4486_s7 = inlined_call_operand.vmem [shape: f32[2,4,1,8], index: 7, kind: input, shape index: {}]   ;;  %s4487_s8 = inlined_call_operand.vmem [shape: bf16[2,4,8,32], index: 8, kind: input, shape index: {}]   ;;  %s4488_s9 = inlined_call_operand.vmem [shape: f32[2,1,32], index: 9, kind: input, shape index: {}]   ;;  %s4489_s10 = inlined_call_operand.vmem [shape: f32[2,1,32], index: 10, kind: input, shape index: {}]   ;;  %s4490_s11 = inlined_call_operand.vmem [shape: f32[2,1,32], index: 11, kind: input, shape index: {}]   ;;  %s4491_s12 = inlined_call_operand.vmem [shape: bf16[2,32,64], index: 12, kind: input, shape index: {}]   ;;  %s4492_s13 = inlined_call_operand.vmem [shape: f32[2,1,64], index: 13, kind: input, shape index: {}]   ;;  %s4493_s14 = inlined_call_operand.vmem [shape: bf16[2,64,32], index: 14, kind: input, shape index: {}]   ;;  %s4494_s15 = inlined_call_operand.vmem [shape: f32[2,1,32], index: 15, kind: input, shape index: {}]   ;;  %s4495_s16 = inlined_call_operand.vmem [shape: f32[2,1,32], index: 16, kind: input, shape index: {}]   ;;  %s4496_s17 = inlined_call_operand.vmem [shape: f32[2,1,32], index: 17, kind: input, shape index: {}]   ;;  %s4497_s18 = inlined_call_operand.vmem [shape: bf16[32,32], index: 18, kind: input, shape index: {}]   ;;  %s4498_s19 = inlined_call_operand.vmem [shape: f32[1,32], index: 19, kind: input, shape index: {}]   ;;  %s4499_s20 = inlined_call_operand.vmem [shape: bf16[32,64], index: 20, kind: input, shape index: {}]   ;;  %s4500_s21 = inlined_call_operand.vmem [shape: f32[1,64], index: 21, kind: input, shape index: {}]   ;;  %s4501_s22 = inlined_call_operand.vmem [shape: bf16[64,3], index: 22, kind: input, shape index: {}]   ;;  %s4502_s23 = inlined_call_operand.vmem [shape: f32[1,3], index: 23, kind: input, shape index: {}]   ;;  %s4503_s24 = inlined_call_operand.vmem [shape: f32[2,8,3], index: 24, kind: output, shape index: {0}]   ;;  %s4504_s25 = inlined_call_operand.vmem [shape: f32[2,2,4,8,8], index: 25, kind: output, shape index: {1}]  }
   0x1   :  { %4516 = sst [smem:[#allocation13_spill]] %s4479_s0 }
   0x2   :  { %4517 = sst [smem:[#allocation14_spill]] %s4480_s1 }
   0x3   :  { %4518 = sst [smem:[#allocation15_spill]] %s4481_s2  ;;  %s4012_s2 = smov 0  }
   0x4   :  { %4519 = sst [smem:[#allocation16_spill]] %s4482_s3 }
   0x5   :  { %4520 = sst [smem:[#allocation17_spill]] %s4483_s4 }
   0x6   :  { %4521 = sst [smem:[#allocation18_spill]] %s4484_s5 }
   0x7   :  { %4522 = sst [smem:[#allocation19_spill]] %s4485_s6  ;;  %s4014_s6 = smov 0  }
   0x8   :  { %4523 = sst [smem:[#allocation20_spill]] %s4486_s7  ;;  %s4018_s7 = smov 0  }
   0x9   :  { %4524 = sst [smem:[#allocation21_spill]] %s4487_s8 }
   0xa   :  { %4525 = sst [smem:[#allocation22_spill]] %s4488_s9 }
   0xb   :  { %4526 = sst [smem:[#allocation23_spill]] %s4489_s10 }
   0xc   :  { %4527 = sst [smem:[#allocation24_spill]] %s4490_s11 }
   0xd   :  { %4528 = sst [smem:[#allocation25_spill]] %s4491_s12 }
   0xe   :  { %4529 = sst [smem:[#allocation26_spill]] %s4492_s13 }
   0xf   :  { %4530 = sst [smem:[#allocation27_spill]] %s4493_s14 }
  0x10   :  { %4531 = sst [smem:[#allocation28_spill]] %s4496_s17 }
  0x11   :  { %4532 = sst [smem:[#allocation29_spill]] %s4497_s18 }
  0x12   :  { %4533 = sst [smem:[#allocation30_spill]] %s4498_s19 }
  0x13   :  { %4534 = sst [smem:[#allocation31_spill]] %s4499_s20 }
  0x14   :  { %4535 = sst [smem:[#allocation32_spill]] %s4500_s21 }
  0x15   :  { %4536 = sst [smem:[#allocation33_spill]] %s4501_s22 }
  0x16   :  { %4537 = sst [smem:[#allocation34_spill]] %s4502_s23 }
  0x17   :  { %4538 = sst [smem:[#allocation35_spill]] %s4503_s24 }
  0x18   :  { %4539 = sst [smem:[#allocation36_spill]] %s4504_s25 }
  0x19 LB: > { %4540 = sst [smem:[#allocation3_spill]] %s3858_s29  ;;  %s45_s3 = sadd.s32 1, %s3866_s6  ;;  %s3874_s7 = sphi %s4018_s7, %s36_s7   ;;  %s3870_s30 = sphi %s4016_s30, %s4597_s30   ;;  %s3866_s6 = sphi %s4014_s6, %s4596_s6   ;;  %s3862_s2 = sphi %s4012_s2, %s4595_s2   ;;  %s3858_s29 = sphi %s4010_s29, %s4594_s29  }
  0x1a   : > { %4541 = sst [smem:[#allocation4_spill]] %s3866_s6  ;;  %s48_s26 = sadd.s32 1, %s3870_s30 }
  0x1b   : > { %4542 = sst [smem:[#allocation5_spill]] %s3870_s30  ;;  %p46_p0 = scmp.ge.s32.totalorder %s45_s3, 2 }
  0x1c   : > { %4543 = sst [smem:[#allocation6_spill]] %s3874_s7  ;;  %p3263_p1 = scmp.ge.s32.totalorder %s3874_s7, 1 }
  0x1d   : > { %p855_p2 = scmp.lt.s32.totalorder %s3874_s7, 5  ;;  %s4599_s3 = smov (%p46_p0, %s45_s3), 0 }
  0x1e   : > { %4544 = sst [smem:[#allocation7_spill]] %s4599_s3  ;;  %s4601_s26 = smov (!%p46_p0, %s48_s26), %s3870_s30 }
  0x1f   : > { %p856_p3 = pnand %p3263_p1, %p855_p2  ;;  %p50_p4 = scmp.ge.s32.totalorder %s4601_s26, 2 }
  0x21   : > { %s4603_s26 = smov (%p50_p4, %s4601_s26), 0  ;;  %859 = sbr.rel (%p856_p3) target bundleno = 5731 (0x1663), region = 116 }
  0x22   : > { %4545 = sst [smem:[#allocation8_spill]] %s4603_s26 }
  0x28   : > { %p997_p5 = scmp.lt.s32.totalorder %s3862_s2, 1  ;;  %p1005_p6 = scmp.lt.s32.totalorder %s3858_s29, 1 }
  0x29   : > { %s4546_s9 = sld [smem:[#allocation13_spill]]  ;;  %s4548_s19 = sld [smem:[#allocation15_spill]] }
  0x2a   : > { %s4605_s2 = smov (!%p997_p5, %s3862_s2), 1  ;;  %s4550_s18 = sld [smem:[#allocation16_spill]] }
  0x2b   : > { %s4046_s1 = scalar_select %p1005_p6, %s3858_s29, 1 }
  0x2c   : > { %s4049_s8 = sshll.u32 %s4605_s2, 3  ;;  %s3282_s27 = sshll.u32 %s4605_s2, 2 }
  0x2d   : > { %s3429_s6 = sshll.u32 %s4046_s1, 6  ;;  %s3268_s7 = sshll.u32 %s4046_s1, 2 }
  0x2e   : > { %s4552_s26 = sld [smem:[#allocation17_spill]]  ;;  %s4554_s29 = sld [smem:[#allocation18_spill]] }
  0x2f   : > { %s1000_s5 = scalar_lea.vmem %s4546_s9, %s4049_s8  ;;  %s4065_s22 = scalar_lea.vmem %s4548_s19, %s3429_s6 }
  0x30   : > { %4549 = sst [smem:[#allocation9_spill]] %s4065_s22  ;;  %s4070_s4 = scalar_lea.vmem %s4550_s18, %s3268_s7 }
  0x31   : > { %4551 = sst [smem:[#allocation10_spill]] %s4070_s4  ;;  %s4556_s22 = sld [smem:[#allocation19_spill]] }
  0x32   : > { %s4557_s4 = sld [smem:[#allocation20_spill]]  ;;  %s3432_s28 = sshll.u32 %s4046_s1, 4 }
  0x33   : > { %s4562_s12 = sld [smem:[#allocation25_spill]]  ;;  %s3434_s30 = sshll.u32 %s4046_s1, 5 }
  0x34   : > { %s4075_s3 = scalar_lea.vmem %s4552_s26, %s3429_s6  ;;  %s4080_s21 = scalar_lea.vmem %s4554_s29, %s3268_s7 }
  0x35   : > { %4553 = sst [smem:[#allocation11_spill]] %s4075_s3  ;;  %s4559_s29 = sld [smem:[#allocation21_spill]] }
  0x36   : > { %4555 = sst [smem:[#allocation12_spill]] %s4080_s21  ;;  %s4564_s14 = sld [smem:[#allocation27_spill]] }
  0x37   : > { %s4085_s20 = scalar_lea.vmem %s4556_s22, %s3429_s6  ;;  %s1061_s6 = scalar_lea.vmem %s4494_s15, %s4046_s1 }
  0x38   : > { %s4090_s25 = scalar_lea.vmem %s4557_s4, %s3268_s7  ;;  %s1064_s7 = scalar_lea.vmem %s4495_s16, %s4046_s1 }
  0x39   : > { %s4113_s2 = scalar_lea.vmem %s4562_s12, %s3432_s28  ;;  %s4565_s22 = sld [smem:[#allocation28_spill]] }
  0x3a   : > { %s4566_s26 = sld [smem:[#allocation35_spill]]  ;;  %s3283_s11 = sshll.u32 %s4046_s1, 3 }
  0x3b   : > { %s4100_s21 = scalar_lea.vmem %s4559_s29, %s3432_s28  ;;  %s1078_s0 = sadd.s32 %s3283_s11, %s3282_s27 }
  0x3c   : > { %s4123_s24 = scalar_lea.vmem %s4564_s14, %s3434_s30  ;;  %s3284_s30 = sshll.u32 %s1078_s0, 3 }
  0x3d   : > { %s4567_s10 = sld [smem:[#allocation36_spill]]  ;;  %s4568_s19 = sld [smem:[#allocation3_spill]] }
  0x3f   : > { %s1067_s12 = scalar_lea.vmem %s4565_s22, %s4046_s1 }
  0x40   : > { %s1071_s13 = scalar_lea.vmem %s4566_s26, %s4049_s8 }
  0x43   : > { %s4145_s17 = scalar_lea.vmem %s4567_s10, %s3284_s30  ;;  %p3285_p7 = scmp.ne.s32.totalorder %s4568_s19, 0 }
  0x44   : > { %v1086_v0 = vld [vmem:[%s1000_s5] sm:$0xff] (!%p3285_p7)  ;;  %vm1087_vm0 = vcmask (!%p3285_p7), 261120  }
  0x45   : > { %1085 = sbr.rel (%p3285_p7) target bundleno = 76 (0x4c), region = 120  ;;  %1088 = vst.msk [vmem:[#allocation2] sm:$0xff] (!%p3285_p7), %vm1087_vm0, %v1086_v0 }
  0x4c PF: > { %s4569_s22 = sld [smem:[#allocation11_spill]]  ;;  %s4570_s18 = sld [smem:[#allocation9_spill]]  ;;  %v3876_v2 = vmov 0.0   ;;  %vm3877_vm1 = vmmov 0   ;;  %v4156_v5 = vld [vmem:[#allocation2] sm:$0xff]  ;;  %vm1115_vm2 = vcmask 261120  }
  0x4d   : > { %3522 = vmatprep.subr.bf16.mxu1 %v3876_v2  ;;  %3514 = vmatprep.subr.bf16.mxu0 %v3876_v2  ;;  %s4571_s10 = sld [smem:[#allocation12_spill]]  ;;  %v4163_v7 = vpack.c.bf16 %v4156_v5, %v4156_v5  ;;  %s4572_s11 = sld [smem:[#allocation10_spill]]  ;;  %vm1287_vm3 = vcmask 64512   ;;  %v3778_v23 = vld [vmem:[%s4085_s20] sm:$0xff]   ;;  %v3779_v24 = vld [vmem:[%s4085_s20 + $0x8] sm:$0xff]   ;;  %vm1351_vm4 = vcmask 1043456  }
  0x4e   : > { %3526 = vmatprep.mubr.msk.bf16.mxu1 %vm3877_vm1, %v3876_v2  ;;  %3518 = vmatprep.mubr.msk.bf16.mxu0 %vm3877_vm1, %v3876_v2  ;;  %s4573_s5 = sld [smem:[#allocation14_spill]]  ;;  %v3294_v40 = vld [vmem:[%s4090_s25] ss:$0 sm:$0xff]  ;;  %s4577_s9 = sld [smem:[#allocation23_spill]]  ;;  %vm2659_vm5 = vcmask 523264  }
  0x4f   : > { %s4579_s29 = sld [smem:[#allocation24_spill]] }
  0x52   : > { %v3774_v1 = vld [vmem:[%s4569_s22] sm:$0xff]   ;;  %v3775_v3 = vld [vmem:[%s4569_s22 + $0x8] sm:$0xff]   ;;  %v3782_v45 = vld [vmem:[%s4570_s18 + $0x10] sm:$0xff]  }
  0x53   : > { %3523 = vmatpush3.bf16.msra.mxu1 %v3774_v1  ;;  %v3776_v4 = vld [vmem:[%s4570_s18] sm:$0xff]   ;;  %v3777_v6 = vld [vmem:[%s4570_s18 + $0x8] sm:$0xff]   ;;  %v3783_v46 = vld [vmem:[%s4570_s18 + $0x18] sm:$0xff]  }
  0x54   : > { %3524 = vmatprep.subr.bf16.mxu1 %v3876_v2  ;;  %3515 = vmatpush3.bf16.msra.mxu0 %v3776_v4  ;;  %v3290_v8 = vld [vmem:[%s4571_s10] ss:$0 sm:$0xff]  ;;  %s4574_s26 = scalar_lea.vmem %s4573_s5, %s4049_s8  ;;  %v3780_v50 = vld [vmem:[%s4569_s22 + $0x10] sm:$0xff]   ;;  %v3781_v52 = vld [vmem:[%s4569_s22 + $0x18] sm:$0xff]   ;;  %s4578_s3 = scalar_lea.vmem %s4577_s9, %s4046_s1 }
  0x55   : > { %3516 = vmatprep.subr.bf16.mxu0 %v3876_v2  ;;  %v3286_v13 = vld [vmem:[%s4572_s11] ss:$0 sm:$0xff]  ;;  %v3314_v61 = vld [vmem:[%s4571_s10 + $0x1] ss:$0 sm:$0xff] }
  0x56   : > { %v4196_v25 = vld [vmem:[%s4574_s26] sm:$0xff]  ;;  %s4584_s26 = sld [smem:[#allocation3_spill]] }
  0x57   : > { %3525 = vmatpush3.bf16.msra.mxu1 %v3775_v3  ;;  %v3305_v3 = vld [vmem:[%s4572_s11 + $0x1] ss:$0 sm:$0xff] }
  0x58   : > { %3538 = vmatprep.subr.bf16.mxu1 %v3876_v2  ;;  %3517 = vmatpush3.bf16.msra.mxu0 %v3777_v6 }
  0x59   : > { %3530 = vmatprep.subr.bf16.mxu0 %v3876_v2 }
  0x5a   : > { %3527 = vmatmul.mubr.msk.bf16.vlgmr.msra.gmra.mrb[0].mxu1 %vm1115_vm2, %v4163_v7 }
  0x5b   : > { %3540 = vmatprep.mubr.msk.bf16.mxu1 %vm3877_vm1, %v3876_v2  ;;  %3519 = vmatmul.mubr.msk.bf16.vlgmr.msra.gmra.mrb[0].mxu0 %vm1115_vm2, %v4163_v7 }
  0x5c   : > { %3534 = vmatprep.mubr.msk.bf16.mxu0 %vm3877_vm1, %v3876_v2  ;;  %3531 = vmatpush3.bf16.msra.mxu0 %v3778_v23  ;;  %p3412_p8 = scmp.ne.s32.totalorder %s4584_s26, 1 }
  0x5d   : > { %3532 = vmatprep.subr.bf16.mxu0 %v3876_v2  ;;  %vm3879_vm6 = vmmov (!%p3412_p8), 0   ;;  %s4586_s28 = sld [smem:[#allocation31_spill]] (!%p3412_p8)  ;;  %s4587_s30 = sld [smem:[#allocation33_spill]] (!%p3412_p8)  ;;  %vm2957_vm7 = vcmask (!%p3412_p8), 23552  }
  0x5e   : > { %s4590_s5 = sld [smem:[#allocation32_spill]] (!%p3412_p8) }
  0x60   : > { %3533 = vmatpush3.bf16.msra.mxu0 %v3779_v24 }
  0x61   : > { %3544 = vmatprep.subr.bf16.mxu0 %v3876_v2 }
  0x63   : > { %3535 = vmatmul.mubr.msk.bf16.vlgmr.msra.gmra.mrb[4].mxu0 %vm1115_vm2, %v4163_v7 }
  0x64   : > { %3546 = vmatprep.mubr.msk.bf16.mxu0 %vm3877_vm1, %v3876_v2 }
 0x12d   : > { %v1216_v9 = vpop.f32.mrb[0].mxu1 }
 0x12e   : > { %v1217_v10 = vadd.f32 %v3290_v8, %v1216_v9  ;;  %v3528_v11 = vpop.f32.mrb[1].mxu1  ;;  %v1153_v14 = vpop.f32.mrb[0].mxu0 }
 0x12f   : > { %v1219_v12 = vpop.f32.mrb[2].mxu1  ;;  %v3520_v17 = vpop.f32.mrb[1].mxu0  ;;  %v1154_v20 = vadd.f32 %v3286_v13, %v1153_v14  ;;  %v3784_v11 = vld [vmem:[%s4085_s20 + $0x10] sm:$0xff]  }
 0x130   : > { %v1286_v15 = vpack.c.bf16 %v1217_v10, %v1217_v10  ;;  %v3529_v16 = vpop.f32.mrb[3].mxu1  ;;  %v1156_v18 = vpop.f32.mrb[2].mxu0  ;;  %v3785_v12 = vld [vmem:[%s4085_s20 + $0x18] sm:$0xff]  }
 0x131   : > { %v3521_v21 = vpop.f32.mrb[3].mxu0  ;;  %v1285_v22 = vpack.c.bf16 %v1154_v20, %v1154_v20 }
 0x132   : > { %v1292_v19 = vsel %vm1287_vm3, %v1286_v15, 0 }
 0x133   : > { %3539 = vmatpush3.bf16.xpose.msra.mxu1 %v1292_v19  ;;  %v3323_v19 = vld [vmem:[%s4090_s25 + $0x1] ss:$0 sm:$0xff] }
 0x134   : > { %3550 = vmatprep.subr.bf16.mxu1 %v3876_v2 }
 0x136   : > { %v1279_v37 = vpop.f32.mrb[4].mxu0 }
 0x137   : > { %v3536_v38 = vpop.f32.mrb[5].mxu0  ;;  %v1280_v42 = vadd.f32 %v3294_v40, %v1279_v37  ;;  %v1396_v37 = vld [vmem:[%s4100_s21] sm:$0xf] }
 0x138   : > { %v1282_v39 = vpop.f32.mrb[6].mxu0  ;;  %v1754_v40 = vsel %vm1351_vm4, %v1396_v37, 0 }
 0x139   : > { %v3537_v41 = vpop.f32.mrb[7].mxu0  ;;  %v1347_v43 = vpack.c.bf16 %v1280_v42, %v1280_v42 }
 0x13a   : > { %3541 = vmatmul.mubr.msk.bf16.vlgmr.msra.gmra.mrb[4].mxu1 %vm1287_vm3, %v1285_v22  ;;  %v3786_v41 = vld [vmem:[%s4569_s22 + $0x20] sm:$0xff]  }
 0x13b   : > { %3554 = vmatprep.mubr.msk.bf16.mxu1 %vm3877_vm1, %v3876_v2  ;;  %v1353_v44 = vsel %vm1351_vm4, %v1347_v43, 0  ;;  %3551 = vmatpush3.bf16.msra.mxu1 %v3782_v45  ;;  %v3787_v43 = vld [vmem:[%s4569_s22 + $0x28] sm:$0xff]   ;;  %v3788_v45 = vld [vmem:[%s4570_s18 + $0x20] sm:$0xff]  }
 0x13c   : > { %3545 = vmatpush3.bf16.msra.mxu0 %v1353_v44  ;;  %3552 = vmatprep.subr.bf16.mxu1 %v3876_v2 }
 0x13d   : > { %3558 = vmatprep.subr.bf16.mxu0 %v3876_v2 }
 0x13f   : > { %3553 = vmatpush3.bf16.msra.mxu1 %v3783_v46 }
 0x140   : > { %3566 = vmatprep.subr.bf16.mxu1 %v3876_v2 }
 0x142   : > { %3555 = vmatmul.mubr.msk.bf16.vlgmr.msra.gmra.mrb[8].mxu1 %vm1115_vm2, %v4163_v7 }
 0x143   : > { %3570 = vmatprep.mubr.msk.bf16.mxu1 %vm3877_vm1, %v3876_v2  ;;  %3567 = vmatpush3.bf16.msra.mxu1 %v3784_v11 }
 0x144   : > { %3568 = vmatprep.subr.bf16.mxu1 %v3876_v2 }
 0x147   : > { %3569 = vmatpush3.bf16.msra.mxu1 %v3785_v12 }
 0x148   : > { %3580 = vmatprep.subr.bf16.mxu1 %v3876_v2 }
 0x14a   : > { %3571 = vmatmul.mubr.msk.bf16.vlgmr.msra.gmra.mrb[12].mxu1 %vm1115_vm2, %v4163_v7 }
 0x14b   : > { %3582 = vmatprep.mubr.msk.bf16.mxu1 %vm3877_vm1, %v3876_v2 }
 0x20d   : > { %v1328_v26 = vpop.f32.mrb[4].mxu1 }
 0x20e   : > { %v1329_v27 = vadd.f32 %v1328_v26, %v4196_v25  ;;  %v3542_v28 = vpop.f32.mrb[5].mxu1 }
 0x20f   : > { %v1331_v29 = vpop.f32.mrb[6].mxu1 }
 0x210   : > { %v3543_v30 = vpop.f32.mrb[7].mxu1  ;;  %v1334_v31 = vsel %vm1287_vm3, %v1329_v27, -inf }
 0x211   : > { %1335 = vmax.xlane.f32.xlu0 %v1334_v31 }
 0x215   : > { %v1456_v53 = vpop.f32.mrb[8].mxu1 }
 0x216   : > { %v3556_v54 = vpop.f32.mrb[9].mxu1  ;;  %v1457_v9 = vadd.f32 %v3305_v3, %v1456_v53 }
 0x217   : > { %v1459_v55 = vpop.f32.mrb[10].mxu1 }
 0x218   : > { %v3557_v56 = vpop.f32.mrb[11].mxu1  ;;  %v1592_v10 = vpack.c.bf16 %v1457_v9, %v1457_v9  ;;  %v3347_v55 = vld [vmem:[%s4571_s10 + $0x2] ss:$0 sm:$0xff] }
 0x21d   : > { %v1586_v20 = vpop.f32.mrb[12].mxu1 }
 0x21e   : > { %v1587_v21 = vadd.f32 %v3323_v19, %v1586_v20  ;;  %v3572_v22 = vpop.f32.mrb[13].mxu1 }
 0x21f   : > { %v1589_v23 = vpop.f32.mrb[14].mxu1 }
 0x220   : > { %v1654_v24 = vpack.c.bf16 %v1587_v21, %v1587_v21  ;;  %v3573_v26 = vpop.f32.mrb[15].mxu1 }
 0x29e   : > { %v1336_v32 = vpop.xlane.xlu0 %1335 }
 0x29f   : > { %v1337_v33 = vsub.f32 %v1329_v27, %v1336_v32  ;;  %v1659_v27 = vsel %vm1351_vm4, %v1654_v24, 0 }
 0x2a0   : > { %3581 = vmatpush3.bf16.msra.mxu1 %v1659_v27 }
 0x2a1   : > { %v1338_v34 = vmul.f32 1.442695, %v1337_v33  ;;  %3592 = vmatprep.subr.bf16.mxu1 %v3876_v2  ;;  %v3330_v33 = vld [vmem:[%s4100_s21 + $0x4] sm:$0xf] }
 0x2a3   : > { %3804 = vpow2.f32 %v1338_v34  ;;  %v1708_v34 = vsel %vm1351_vm4, %v3330_v33, 0 }
 0x2ad   : > { %v3805_v35 = vpop.eup %3804 }
 0x2ae   : > { %v1340_v36 = vsel %vm1287_vm3, %v3805_v35, 0.0 }
 0x2af   : > { %1341 = vadd.xlane.f32.xlu0 %v1340_v36 }
 0x33c   : > { %v1342_v47 = vpop.xlane.xlu0 %1341 }
 0x33d   : > { %3806 = vrcp.f32 %v1342_v47 }
 0x347   : > { %v3807_v48 = vpop.eup %3806 }
 0x348   : > { %v1344_v49 = vmul.f32 %v3807_v48, %v3805_v35 }
 0x34a   : > { %1345 = vst.msk [vmem:[%s4145_s17] sm:$0xff] %vm1287_vm3, %v1344_v49  ;;  %v1346_v51 = vpack.c.bf16 %v1344_v49, %v1344_v49 }
 0x34c   : > { %3547 = vmatmul.mubr.msk.bf16.vlgmr.msra.gmra.mrb[8].mxu0 %vm1287_vm3, %v1346_v51 }
 0x34d   : > { %3559 = vmatpush3.bf16.msra.mxu0 %v3780_v50  ;;  %3562 = vmatprep.mubr.msk.bf16.mxu0 %vm3877_vm1, %v3876_v2  ;;  %v3789_v50 = vld [vmem:[%s4570_s18 + $0x28] sm:$0xff]  }
 0x34e   : > { %3560 = vmatprep.subr.bf16.mxu0 %v3876_v2 }
 0x351   : > { %3561 = vmatpush3.bf16.msra.mxu0 %v3781_v52 }
 0x352   : > { %3574 = vmatprep.subr.bf16.mxu0 %v3876_v2 }
 0x354   : > { %3563 = vmatmul.mubr.msk.bf16.vlgmr.msra.gmra.mrb[12].mxu0 %vm1115_vm2, %v4163_v7 }
 0x355   : > { %3576 = vmatprep.mubr.msk.bf16.mxu0 %vm3877_vm1, %v3876_v2 }
 0x41f   : > { %v4225_v57 = vpop.f32.mrb[8].mxu0 }
 0x420   : > { %v3548_v58 = vpop.f32.mrb[9].mxu0  ;;  %v1395_v42 = vpack.c.bf16 %v4225_v57, %v4225_v57 }
 0x421   : > { %v1392_v59 = vpop.f32.mrb[10].mxu0 }
 0x422   : > { %v3549_v60 = vpop.f32.mrb[11].mxu0 }
 0x427   : > { %v1521_v62 = vpop.f32.mrb[12].mxu0 }
 0x428   : > { %v1522_v63 = vadd.f32 %v3314_v61, %v1521_v62  ;;  %v3564_v0 = vpop.f32.mrb[13].mxu0 }
 0x429   : > { %v1524_v1 = vpop.f32.mrb[14].mxu0 }
 0x42a   : > { %v1593_v4 = vpack.c.bf16 %v1522_v63, %v1522_v63  ;;  %v3565_v6 = vpop.f32.mrb[15].mxu0 }
 0x42b   : > { %v3338_v6 = vld [vmem:[%s4572_s11 + $0x2] ss:$0 sm:$0xff] }
 0x42c   : > { %v1598_v8 = vsel %vm1287_vm3, %v1593_v4, 0 }
 0x42d   : > { %3575 = vmatpush3.bf16.xpose.msra.mxu0 %v1598_v8 }
 0x42e   : > { %3586 = vmatprep.subr.bf16.mxu0 %v3876_v2 }
 0x434   : > { %3577 = vmatmul.mubr.msk.bf16.vlgmr.msra.gmra.mrb[16].mxu0 %vm1287_vm3, %v1592_v10 }
 0x435   : > { %3588 = vmatprep.mubr.msk.bf16.mxu0 %vm3877_vm1, %v3876_v2  ;;  %3587 = vmatpush3.bf16.msra.mxu0 %v1708_v34 }
 0x436   : > { %3598 = vmatprep.subr.bf16.mxu0 %v3876_v2 }
 0x507   : > { %v1634_v13 = vpop.f32.mrb[16].mxu0 }
 0x508   : > { %v1635_v14 = vadd.f32 %v1634_v13, %v4196_v25  ;;  %v3578_v15 = vpop.f32.mrb[17].mxu0 }
 0x509   : > { %v1637_v16 = vpop.f32.mrb[18].mxu0  ;;  %v3791_v15 = vld [vmem:[%s4085_s20 + $0x28] sm:$0xff]  }
 0x50a   : > { %v3579_v17 = vpop.f32.mrb[19].mxu0  ;;  %v1640_v18 = vsel %vm1287_vm3, %v1635_v14, -inf }
 0x50b   : > { %1641 = vmax.xlane.f32.xlu1 %v1640_v18 }
 0x598   : > { %v1642_v28 = vpop.xlane.xlu1 %1641 }
 0x599   : > { %v1643_v29 = vsub.f32 %v1635_v14, %v1642_v28  ;;  %v3790_v14 = vld [vmem:[%s4085_s20 + $0x20] sm:$0xff]  }
 0x59b   : > { %v1644_v30 = vmul.f32 1.442695, %v1643_v29 }
 0x59d   : > { %3808 = vpow2.f32 %v1644_v30 }
 0x5a7   : > { %v3809_v31 = vpop.eup %3808 }
 0x5a8   : > { %v1646_v32 = vsel %vm1287_vm3, %v3809_v31, 0.0 }
 0x5a9   : > { %1647 = vadd.xlane.f32.xlu1 %v1646_v32 }
 0x636   : > { %v1648_v35 = vpop.xlane.xlu1 %1647 }
 0x637   : > { %3810 = vrcp.f32 %v1648_v35 }
 0x641   : > { %v3811_v36 = vpop.eup %3810 }
 0x642   : > { %v1650_v38 = vmul.f32 %v3811_v36, %v3809_v31  ;;  %v3356_v31 = vld [vmem:[%s4090_s25 + $0x2] ss:$0 sm:$0xff]  ;;  %v3363_v36 = vld [vmem:[%s4100_s21 + $0x8] sm:$0xf] }
 0x643   : > { %v2107_v37 = vsel %vm1351_vm4, %v3363_v36, 0 }
 0x644   : > { %3328 = vst.msk [vmem:[%s4145_s17 + $0x8] sm:$0xff] %vm1287_vm3, %v1650_v38  ;;  %v1653_v39 = vpack.c.bf16 %v1650_v38, %v1650_v38 }
 0x646   : > { %3583 = vmatmul.mubr.msk.bf16.vlgmr.msra.gmra.mrb[16].mxu1 %vm1287_vm3, %v1653_v39 }
 0x647   : > { %3593 = vmatpush3.bf16.msra.mxu1 %v1754_v40  ;;  %3594 = vmatprep.mubr.msk.bf16.mxu1 %vm3877_vm1, %v3876_v2 }
 0x648   : > { %3606 = vmatprep.subr.bf16.mxu1 %v3876_v2 }
 0x64e   : > { %3595 = vmatmul.mubr.msk.bf16.vlgmr.msra.gmra.mrb[20].mxu1 %vm1287_vm3, %v1395_v42  ;;  %v3794_v42 = vld [vmem:[%s4570_s18 + $0x30] sm:$0xff]  }
 0x64f   : > { %3607 = vmatpush3.bf16.msra.mxu1 %v3786_v41  ;;  %3610 = vmatprep.mubr.msk.bf16.mxu1 %vm3877_vm1, %v3876_v2 }
 0x650   : > { %3608 = vmatprep.subr.bf16.mxu1 %v3876_v2 }
 0x653   : > { %3609 = vmatpush3.bf16.msra.mxu1 %v3787_v43  ;;  %v3795_v43 = vld [vmem:[%s4570_s18 + $0x38] sm:$0xff]  }
 0x654   : > { %3622 = vmatprep.subr.bf16.mxu1 %v3876_v2 }
 0x656   : > { %3611 = vmatmul.mubr.msk.bf16.vlgmr.msra.gmra.mrb[24].mxu1 %vm1115_vm2, %v4163_v7 }
 0x657   : > { %3624 = vmatprep.mubr.msk.bf16.mxu1 %vm3877_vm1, %v3876_v2 }
 0x719   : > { %v1695_v44 = vpop.f32.mrb[16].mxu1 }
 0x71a   : > { %v1701_v46 = vpack.c.bf16 %v1695_v44, %v1695_v44  ;;  %v3584_v47 = vpop.f32.mrb[17].mxu1 }
 0x71b   : > { %v1698_v48 = vpop.f32.mrb[18].mxu1 }
 0x71c   : > { %v3585_v49 = vpop.f32.mrb[19].mxu1  ;;  %3589 = vmatmul.mubr.msk.bf16.vlgmr.msra.gmra.mrb[20].mxu0 %vm1287_vm3, %v1701_v46 }
 0x71d   : > { %3599 = vmatpush3.bf16.msra.mxu0 %v3788_v45  ;;  %3602 = vmatprep.mubr.msk.bf16.mxu0 %vm3877_vm1, %v3876_v2  ;;  %v3792_v45 = vld [vmem:[%s4569_s22 + $0x30] sm:$0xff]  }
 0x71e   : > { %3600 = vmatprep.subr.bf16.mxu0 %v3876_v2 }
 0x721   : > { %v1790_v51 = vpop.f32.mrb[20].mxu1  ;;  %3601 = vmatpush3.bf16.msra.mxu0 %v3789_v50  ;;  %v3793_v50 = vld [vmem:[%s4569_s22 + $0x38] sm:$0xff]   ;;  %s4581_s22 = sld [smem:[#allocation26_spill]] }
 0x722   : > { %v3596_v52 = vpop.f32.mrb[21].mxu1  ;;  %3614 = vmatprep.subr.bf16.mxu0 %v3876_v2 }
 0x723   : > { %v1793_v53 = vpop.f32.mrb[22].mxu1 }
 0x724   : > { %v3597_v54 = vpop.f32.mrb[23].mxu1  ;;  %3603 = vmatmul.mubr.msk.bf16.vlgmr.msra.gmra.mrb[24].mxu0 %vm1115_vm2, %v4163_v7 }
 0x725   : > { %3618 = vmatprep.mubr.msk.bf16.mxu0 %vm3877_vm1, %v3876_v2  ;;  %3615 = vmatpush3.bf16.msra.mxu0 %v3790_v14 }
 0x726   : > { %3616 = vmatprep.subr.bf16.mxu0 %v3876_v2 }
 0x727   : > { %s4582_s18 = scalar_lea.vmem %s4581_s22, %s4046_s1 }
 0x729   : > { %v1920_v56 = vpop.f32.mrb[24].mxu1  ;;  %3617 = vmatpush3.bf16.msra.mxu0 %v3791_v15 }
 0x72a   : > { %v1921_v57 = vadd.f32 %v3347_v55, %v1920_v56  ;;  %v3612_v58 = vpop.f32.mrb[25].mxu1  ;;  %3628 = vmatprep.subr.bf16.mxu0 %v3876_v2 }
 0x72b   : > { %v1923_v59 = vpop.f32.mrb[26].mxu1 }
 0x72c   : > { %v1992_v60 = vpack.c.bf16 %v1921_v57, %v1921_v57  ;;  %v3613_v61 = vpop.f32.mrb[27].mxu1  ;;  %3619 = vmatmul.mubr.msk.bf16.vlgmr.msra.gmra.mrb[28].mxu0 %vm1115_vm2, %v4163_v7 }
 0x72d   : > { %3630 = vmatprep.mubr.msk.bf16.mxu0 %vm3877_vm1, %v3876_v2 }
 0x72e   : > { %v1997_v62 = vsel %vm1287_vm3, %v1992_v60, 0  ;;  %v3379_v60 = vld [vmem:[%s4571_s10 + $0x3] ss:$0 sm:$0xff] }
 0x72f   : > { %3623 = vmatpush3.bf16.xpose.msra.mxu1 %v1997_v62 }
 0x730   : > { %3634 = vmatprep.subr.bf16.mxu1 %v3876_v2 }
 0x7ef   : > { %v1744_v63 = vpop.f32.mrb[20].mxu0 }
 0x7f0   : > { %v4286_v0 = vadd.f32 %v1790_v51, %v1744_v63  ;;  %v3590_v1 = vpop.f32.mrb[21].mxu0 }
 0x7f1   : > { %v1747_v3 = vpop.f32.mrb[22].mxu0 }
 0x7f2   : > { %v3591_v4 = vpop.f32.mrb[23].mxu0  ;;  %v3370_v3 = vld [vmem:[%s4572_s11 + $0x3] ss:$0 sm:$0xff] }
 0x7f7   : > { %v1855_v8 = vpop.f32.mrb[24].mxu0 }
 0x7f8   : > { %v1856_v9 = vadd.f32 %v3338_v6, %v1855_v8  ;;  %v3604_v10 = vpop.f32.mrb[25].mxu0 }
 0x7f9   : > { %v1858_v11 = vpop.f32.mrb[26].mxu0  ;;  %v3796_v10 = vld [vmem:[%s4085_s20 + $0x30] sm:$0xff]  }
 0x7fa   : > { %v1991_v12 = vpack.c.bf16 %v1856_v9, %v1856_v9  ;;  %v3605_v13 = vpop.f32.mrb[27].mxu0  ;;  %v3797_v11 = vld [vmem:[%s4085_s20 + $0x38] sm:$0xff]   ;;  %s4575_s20 = sld [smem:[#allocation22_spill]] }
 0x7fc   : > { %3625 = vmatmul.mubr.msk.bf16.vlgmr.msra.gmra.mrb[28].mxu1 %vm1287_vm3, %v1991_v12 }
 0x7fd   : > { %3636 = vmatprep.mubr.msk.bf16.mxu1 %vm3877_vm1, %v3876_v2  ;;  %3635 = vmatpush3.bf16.msra.mxu1 %v2107_v37 }
 0x7fe   : > { %3648 = vmatprep.subr.bf16.mxu1 %v3876_v2 }
 0x7ff   : > { %v1985_v28 = vpop.f32.mrb[28].mxu0 }
 0x800   : > { %v3620_v29 = vpop.f32.mrb[29].mxu0  ;;  %v1986_v33 = vadd.f32 %v3356_v31, %v1985_v28  ;;  %s4576_s23 = scalar_lea.vmem %s4575_s20, %s4046_s1  ;;  %s4585_s20 = sld [smem:[#allocation29_spill]] (!%p3412_p8) }
 0x801   : > { %v1988_v30 = vpop.f32.mrb[30].mxu0 }
 0x802   : > { %v3621_v32 = vpop.f32.mrb[31].mxu0  ;;  %v2053_v34 = vpack.c.bf16 %v1986_v33, %v1986_v33  ;;  %v3395_v30 = vld [vmem:[%s4100_s21 + $0xc] sm:$0xf]  ;;  %s4591_s21 = sld [smem:[#allocation34_spill]] (!%p3412_p8) }
 0x803   : > { %v2461_v31 = vsel %vm1351_vm4, %v3395_v30, 0 }
 0x804   : > { %v2058_v35 = vsel %vm1351_vm4, %v2053_v34, 0 }
 0x805   : > { %3629 = vmatpush3.bf16.msra.mxu0 %v2058_v35 }
 0x806   : > { %3640 = vmatprep.subr.bf16.mxu0 %v3876_v2 }
 0x8cf   : > { %v2033_v16 = vpop.f32.mrb[28].mxu1 }
 0x8d0   : > { %v2034_v17 = vadd.f32 %v2033_v16, %v4196_v25  ;;  %v3626_v18 = vpop.f32.mrb[29].mxu1 }
 0x8d1   : > { %v2036_v19 = vpop.f32.mrb[30].mxu1 }
 0x8d2   : > { %v3627_v20 = vpop.f32.mrb[31].mxu1  ;;  %v2039_v21 = vsel %vm1287_vm3, %v2034_v17, -inf }
 0x8d3   : > { %2040 = vmax.xlane.f32.xlu0 %v2039_v21 }
 0x960   : > { %v2041_v22 = vpop.xlane.xlu0 %2040 }
 0x961   : > { %v2042_v23 = vsub.f32 %v2034_v17, %v2041_v22 }
 0x963   : > { %v2043_v24 = vmul.f32 1.442695, %v2042_v23 }
 0x965   : > { %3812 = vpow2.f32 %v2043_v24 }
 0x96f   : > { %v3813_v26 = vpop.eup %3812 }
 0x970   : > { %v2045_v27 = vsel %vm1287_vm3, %v3813_v26, 0.0 }
 0x971   : > { %2046 = vadd.xlane.f32.xlu1 %v2045_v27 }
 0x9fe   : > { %v2047_v38 = vpop.xlane.xlu1 %2046 }
 0x9ff   : > { %3814 = vrcp.f32 %v2047_v38 }
 0xa09   : > { %v3815_v39 = vpop.eup %3814 }
 0xa0a   : > { %v2049_v40 = vmul.f32 %v3815_v39, %v3813_v26 }
 0xa0c   : > { %3361 = vst.msk [vmem:[%s4145_s17 + $0x10] sm:$0xff] %vm1287_vm3, %v2049_v40  ;;  %v2052_v41 = vpack.c.bf16 %v2049_v40, %v2049_v40 }
 0xa0e   : > { %3631 = vmatmul.mubr.msk.bf16.vlgmr.msra.gmra.mrb[32].mxu0 %vm1287_vm3, %v2052_v41 }
 0xa0f   : > { %3644 = vmatprep.mubr.msk.bf16.mxu0 %vm3877_vm1, %v3876_v2  ;;  %3641 = vmatpush3.bf16.msra.mxu0 %v3794_v42 }
 0xa10   : > { %3642 = vmatprep.subr.bf16.mxu0 %v3876_v2 }
 0xa13   : > { %3643 = vmatpush3.bf16.msra.mxu0 %v3795_v43 }
 0xa14   : > { %3656 = vmatprep.subr.bf16.mxu0 %v3876_v2 }
 0xa16   : > { %3645 = vmatmul.mubr.msk.bf16.vlgmr.msra.gmra.mrb[36].mxu0 %vm1115_vm2, %v4163_v7 }
 0xa17   : > { %3660 = vmatprep.mubr.msk.bf16.mxu0 %vm3877_vm1, %v3876_v2  ;;  %3657 = vmatpush3.bf16.msra.mxu0 %v3796_v10 }
 0xa18   : > { %3658 = vmatprep.subr.bf16.mxu0 %v3876_v2 }
 0xa1b   : > { %3659 = vmatpush3.bf16.msra.mxu0 %v3797_v11 }
 0xa1c   : > { %3670 = vmatprep.subr.bf16.mxu0 %v3876_v2 }
 0xa1e   : > { %3661 = vmatmul.mubr.msk.bf16.vlgmr.msra.gmra.mrb[40].mxu0 %vm1115_vm2, %v4163_v7 }
 0xa1f   : > { %3672 = vmatprep.mubr.msk.bf16.mxu0 %vm3877_vm1, %v3876_v2 }
 0xae1   : > { %v2094_v44 = vpop.f32.mrb[32].mxu0 }
 0xae2   : > { %v2100_v46 = vpack.c.bf16 %v2094_v44, %v2094_v44  ;;  %v3632_v47 = vpop.f32.mrb[33].mxu0 }
 0xae3   : > { %v2097_v48 = vpop.f32.mrb[34].mxu0 }
 0xae4   : > { %v3633_v49 = vpop.f32.mrb[35].mxu0  ;;  %3637 = vmatmul.mubr.msk.bf16.vlgmr.msra.gmra.mrb[32].mxu1 %vm1287_vm3, %v2100_v46 }
 0xae5   : > { %3649 = vmatpush3.bf16.msra.mxu1 %v3792_v45  ;;  %3652 = vmatprep.mubr.msk.bf16.mxu1 %vm3877_vm1, %v3876_v2  ;;  %v3397_v45 = vld [vmem:[%s4576_s23] ss:$0 sm:$0xff] }
 0xae6   : > { %3650 = vmatprep.subr.bf16.mxu1 %v3876_v2 }
 0xae9   : > { %3651 = vmatpush3.bf16.msra.mxu1 %v3793_v50  ;;  %v2209_v51 = vpop.f32.mrb[36].mxu0 }
 0xaea   : > { %3664 = vmatprep.subr.bf16.mxu1 %v3876_v2  ;;  %v3646_v52 = vpop.f32.mrb[37].mxu0  ;;  %v2210_v9 = vadd.f32 %v3370_v3, %v2209_v51 }
 0xaeb   : > { %v2212_v53 = vpop.f32.mrb[38].mxu0 }
 0xaec   : > { %3653 = vmatmul.mubr.msk.bf16.vlgmr.msra.gmra.mrb[36].mxu1 %vm1115_vm2, %v4163_v7  ;;  %v3647_v54 = vpop.f32.mrb[39].mxu0 }
 0xaed   : > { %3666 = vmatprep.mubr.msk.bf16.mxu1 %vm3877_vm1, %v3876_v2 }
 0xaf1   : > { %v2339_v22 = vpop.f32.mrb[40].mxu0 }
 0xaf2   : > { %v3662_v23 = vpop.f32.mrb[41].mxu0 }
 0xaf3   : > { %v2342_v24 = vpop.f32.mrb[42].mxu0  ;;  %v3404_v23 = vld [vmem:[%s1061_s6] ss:$0 sm:$0xff] }
 0xaf4   : > { %v3663_v26 = vpop.f32.mrb[43].mxu0 }
 0xbb7   : > { %v2143_v55 = vpop.f32.mrb[32].mxu1 }
 0xbb8   : > { %v4334_v56 = vadd.f32 %v2143_v55, %v4286_v0  ;;  %v3638_v57 = vpop.f32.mrb[33].mxu1  ;;  %v2345_v0 = vpack.c.bf16 %v2210_v9, %v2210_v9  ;;  %v3798_v55 = vld [vmem:[%s4113_s2] sm:$0xff]   ;;  %v3803_v9 = vld [vmem:[%s4123_s24 + $0x18] sm:$0xff]  }
 0xbb9   : > { %v2146_v58 = vpop.f32.mrb[34].mxu1 }
 0xbba   : > { %v3639_v59 = vpop.f32.mrb[35].mxu1 }
 0xbbf   : > { %v2274_v61 = vpop.f32.mrb[36].mxu1 }
 0xbc0   : > { %v2275_v62 = vadd.f32 %v3379_v60, %v2274_v61  ;;  %v3654_v63 = vpop.f32.mrb[37].mxu1  ;;  %v3398_v60 = vld [vmem:[%s4578_s3] ss:$0 sm:$0xff] }
 0xbc1   : > { %v2277_v1 = vpop.f32.mrb[38].mxu1 }
 0xbc2   : > { %v2346_v4 = vpack.c.bf16 %v2275_v62, %v2275_v62  ;;  %v3655_v6 = vpop.f32.mrb[39].mxu1 }
 0xbc3   : > { %v3801_v6 = vld [vmem:[%s4123_s24 + $0x8] sm:$0xff]  }
 0xbc4   : > { %v2351_v8 = vsel %vm1287_vm3, %v2346_v4, 0  ;;  %v3800_v4 = vld [vmem:[%s4123_s24] sm:$0xff]  }
 0xbc5   : > { %3665 = vmatpush3.bf16.xpose.msra.mxu1 %v2351_v8  ;;  %v3802_v8 = vld [vmem:[%s4123_s24 + $0x10] sm:$0xff]  }
 0xbc6   : > { %3676 = vmatprep.subr.bf16.mxu1 %v3876_v2 }
 0xbcc   : > { %3667 = vmatmul.mubr.msk.bf16.vlgmr.msra.gmra.mrb[40].mxu1 %vm1287_vm3, %v2345_v0  ;;  %v3400_v0 = vld [vmem:[%s4582_s18] ss:$0 sm:$0xff]  ;;  %s4589_s18 = sld [smem:[#allocation30_spill]] (!%p3412_p8) }
 0xbcd   : > { %3678 = vmatprep.mubr.msk.bf16.mxu1 %vm3877_vm1, %v3876_v2  ;;  %3677 = vmatpush3.bf16.msra.mxu1 %v2461_v31 }
 0xbce   : > { %3690 = vmatprep.subr.bf16.mxu1 %v3876_v2 }
 0xc9f   : > { %v2387_v12 = vpop.f32.mrb[40].mxu1 }
 0xca0   : > { %v2388_v13 = vadd.f32 %v2387_v12, %v4196_v25  ;;  %v3668_v14 = vpop.f32.mrb[41].mxu1  ;;  %v3388_v25 = vld [vmem:[%s4090_s25 + $0x3] ss:$0 sm:$0xff] }
 0xca1   : > { %v2390_v15 = vpop.f32.mrb[42].mxu1  ;;  %v2340_v27 = vadd.f32 %v3388_v25, %v2339_v22 }
 0xca2   : > { %v3669_v16 = vpop.f32.mrb[43].mxu1  ;;  %v2393_v17 = vsel %vm1287_vm3, %v2388_v13, -inf }
 0xca3   : > { %2394 = vmax.xlane.f32.xlu0 %v2393_v17  ;;  %v2407_v28 = vpack.c.bf16 %v2340_v27, %v2340_v27 }
 0xca5   : > { %v2412_v29 = vsel %vm1351_vm4, %v2407_v28, 0 }
 0xca6   : > { %3671 = vmatpush3.bf16.msra.mxu0 %v2412_v29 }
 0xca7   : > { %3682 = vmatprep.subr.bf16.mxu0 %v3876_v2 }
 0xd30   : > { %v2395_v18 = vpop.xlane.xlu0 %2394 }
 0xd31   : > { %v2396_v19 = vsub.f32 %v2388_v13, %v2395_v18 }
 0xd33   : > { %v2397_v20 = vmul.f32 1.442695, %v2396_v19 }
 0xd35   : > { %3816 = vpow2.f32 %v2397_v20 }
 0xd3f   : > { %v3817_v21 = vpop.eup %3816 }
 0xd40   : > { %v2399_v7 = vsel %vm1287_vm3, %v3817_v21, 0.0 }
 0xd41   : > { %2400 = vadd.xlane.f32.xlu1 %v2399_v7 }
 0xdce   : > { %v2401_v32 = vpop.xlane.xlu1 %2400 }
 0xdcf   : > { %3818 = vrcp.f32 %v2401_v32 }
 0xdd9   : > { %v3819_v33 = vpop.eup %3818 }
 0xdda   : > { %v2403_v34 = vmul.f32 %v3819_v33, %v3817_v21 }
 0xddc   : > { %3393 = vst.msk [vmem:[%s4145_s17 + $0x18] sm:$0xff] %vm1287_vm3, %v2403_v34  ;;  %v2406_v35 = vpack.c.bf16 %v2403_v34, %v2403_v34  ;;  %s4580_s17 = scalar_lea.vmem %s4579_s29, %s4046_s1 }
 0xddd   : > { %v3399_v62 = vld [vmem:[%s4580_s17] ss:$0 sm:$0xff]  ;;  %s4588_s17 = smov (!%p3412_p8), %s4587_s30 }
 0xdde   : > { %3673 = vmatmul.mubr.msk.bf16.vlgmr.msra.gmra.mrb[44].mxu0 %vm1287_vm3, %v2406_v35 }
 0xddf   : > { %3686 = vmatprep.mubr.msk.bf16.mxu0 %vm3877_vm1, %v3876_v2  ;;  %3683 = vmatpush3.bf16.msra.mxu0 %v3798_v55 }
 0xde0   : > { %3684 = vmatprep.subr.bf16.mxu0 %v3876_v2 }
 0xeb1   : > { %v2448_v36 = vpop.f32.mrb[44].mxu0 }
 0xeb2   : > { %v2454_v37 = vpack.c.bf16 %v2448_v36, %v2448_v36  ;;  %v3674_v38 = vpop.f32.mrb[45].mxu0 }
 0xeb3   : > { %v2451_v39 = vpop.f32.mrb[46].mxu0 }
 0xeb4   : > { %v3675_v40 = vpop.f32.mrb[47].mxu0  ;;  %3679 = vmatmul.mubr.msk.bf16.vlgmr.msra.gmra.mrb[44].mxu1 %vm1287_vm3, %v2454_v37 }
 0xeb5   : > { %3698 = vmatprep.mubr.msk.bf16.mxu1 %vm3877_vm1, %v3876_v2  ;;  %3691 = vmatpush3.bf16.msra.mxu1 %v3800_v4  ;;  %v3410_v40 = vld [vmem:[%s1064_s7] ss:$0 sm:$0xff] }
 0xeb6   : > { %3692 = vmatprep.subr.bf16.mxu1 %v3876_v2 }
 0xeb9   : > { %3693 = vmatpush3.bf16.msra.mxu1 %v3801_v6 }
 0xeba   : > { %3694 = vmatprep.subr.bf16.mxu1 %v3876_v2 }
 0xebd   : > { %3695 = vmatpush3.bf16.msra.mxu1 %v3802_v8 }
 0xebe   : > { %3696 = vmatprep.subr.bf16.mxu1 %v3876_v2 }
 0xec1   : > { %3697 = vmatpush3.bf16.msra.mxu1 %v3803_v9 }
 0xf87   : > { %v2497_v41 = vpop.f32.mrb[44].mxu1 }
 0xf88   : > { %v2503_v42 = vadd.f32 %v2497_v41, %v4334_v56  ;;  %v3680_v43 = vpop.f32.mrb[45].mxu1 }
 0xf89   : > { %v2500_v44 = vpop.f32.mrb[46].mxu1 }
 0xf8a   : > { %v2504_v46 = vadd.f32 %v2503_v42, %v4156_v5  ;;  %v3681_v47 = vpop.f32.mrb[47].mxu1  ;;  %v3799_v5 = vld [vmem:[%s4113_s2 + $0x8] sm:$0xff]   ;;  %v3411_v42 = vld [vmem:[%s1067_s12] ss:$0 sm:$0xff] }
 0xf8b   : > { %3685 = vmatpush3.bf16.msra.mxu0 %v3799_v5  ;;  %v3827_v47 = vld [vmem:[%s4585_s20 + $0x8] sm:$0xff] (!%p3412_p8)  }
 0xf8c   : > { %v2512_v48 = vadd.f32 %v3397_v45, %v2504_v46  ;;  %v3826_v45 = vld [vmem:[%s4585_s20] sm:$0xff] (!%p3412_p8)   ;;  %v3878_v46 = vmov (!%p3412_p8), 0.0  }
 0xf8d   : > { %3702 = vmatprep.subr.bf16.mxu1 (!%p3412_p8), %v3878_v46  ;;  %3718 = vmatprep.subr.bf16.mxu0 (!%p3412_p8), %v3878_v46 }
 0xf8e   : > { %v2515_v49 = vsel %vm1115_vm2, %v2512_v48, 0.0 }
 0xf8f   : > { %2516 = vadd.xlane.f32.xlu0 %v2515_v49  ;;  %v3828_v49 = vld [vmem:[%s4586_s28] sm:$0xff] (!%p3412_p8)  }
0x101c   : > { %v2517_v50 = vpop.xlane.xlu0 %2516 }
0x101d   : > { %v2519_v51 = vmul.f32 0.03125, %v2517_v50  ;;  %v3829_v50 = vld [vmem:[%s4586_s28 + $0x8] sm:$0xff] (!%p3412_p8)  }
0x101f   : > { %v2520_v52 = vsub.f32 %v2512_v48, %v2519_v51  ;;  %v3830_v51 = vld [vmem:[%s4587_s30] sm:$0xff] (!%p3412_p8)  }
0x1021   : > { %v2521_v53 = vmul.f32 %v2520_v52, %v2520_v52 }
0x1023   : > { %v2522_v54 = vsel %vm1115_vm2, %v2521_v53, 0.0  ;;  %v3413_v53 = vld [vmem:[%s4589_s18] ss:$0 sm:$0xff] (!%p3412_p8) }
0x1024   : > { %2523 = vadd.xlane.f32.xlu1 %v2522_v54 }
0x10b1   : > { %v2524_v56 = vpop.xlane.xlu1 %2523 }
0x10b2   : > { %v2525_v57 = vmul.f32 0.03125, %v2524_v56 }
0x10b4   : > { %v2526_v58 = vadd.f32 1e-05, %v2525_v57 }
0x10b6   : > { %3820 = vrsqrt.f32 %v2526_v58 }
0x10c0   : > { %v3821_v59 = vpop.eup %3820 }
0x10c1   : > { %v2528_v61 = vmul.f32 %v3821_v59, %v2520_v52  ;;  %v3831_v52 = vld [vmem:[%s4588_s17 + $0x8] sm:$0xff] (!%p3412_p8)  }
0x10c3   : > { %v2535_v63 = vmul.f32 %v3398_v60, %v2528_v61  ;;  %v3832_v60 = vld [vmem:[%s4588_s17 + $0x10] sm:$0xff] (!%p3412_p8)   ;;  %v3833_v61 = vld [vmem:[%s4588_s17 + $0x18] sm:$0xff] (!%p3412_p8)  }
0x10c5   : > { %v2542_v1 = vadd.f32 %v3399_v62, %v2535_v63  ;;  %v3417_v62 = vld [vmem:[%s4590_s5] ss:$0 sm:$0xff] (!%p3412_p8) }
0x10c7   : > { %v2543_v3 = vpack.c.bf16 %v2542_v1, %v2542_v1 }
0x10c9   : > { %3687 = vmatmul.mubr.msk.bf16.vlgmr.msra.gmra.mrb[48].mxu0 %vm1115_vm2, %v2543_v3 }
0x10ca   : > { %3726 = vmatprep.mubr.msk.bf16.mxu0 (!%p3412_p8), %vm3879_vm6, %v3878_v46  ;;  %3719 = vmatpush3.bf16.msra.mxu0 (!%p3412_p8), %v3830_v51 }
0x10cb   : > { %3720 = vmatprep.subr.bf16.mxu0 (!%p3412_p8), %v3878_v46 }
0x10ce   : > { %3721 = vmatpush3.bf16.msra.mxu0 (!%p3412_p8), %v3831_v52 }
0x10cf   : > { %3722 = vmatprep.subr.bf16.mxu0 (!%p3412_p8), %v3878_v46 }
0x10d2   : > { %3723 = vmatpush3.bf16.msra.mxu0 (!%p3412_p8), %v3832_v60 }
0x10d3   : > { %3724 = vmatprep.subr.bf16.mxu0 (!%p3412_p8), %v3878_v46 }
0x10d6   : > { %3725 = vmatpush3.bf16.msra.mxu0 (!%p3412_p8), %v3833_v61 }
0x119c   : > { %v2604_v10 = vpop.f32.mrb[48].mxu0 }
0x119d   : > { %v2605_v11 = vadd.f32 %v3400_v0, %v2604_v10  ;;  %v3688_v12 = vpop.f32.mrb[49].mxu0  ;;  %v3421_v0 = vld [vmem:[%s4591_s21] ss:$0 sm:$0xff] (!%p3412_p8) }
0x119e   : > { %v2607_v13 = vpop.f32.mrb[50].mxu0 }
0x119f   : > { %v2610_v14 = vmul.f32 %v2605_v11, %v2605_v11  ;;  %v3689_v15 = vpop.f32.mrb[51].mxu0 }
0x11a1   : > { %v2611_v16 = vmul.f32 %v2610_v14, %v2605_v11 }
0x11a3   : > { %v2612_v17 = vmul.f32 0.044715, %v2611_v16 }
0x11a5   : > { %v2613_v18 = vadd.f32 %v2612_v17, %v2605_v11 }
0x11a7   : > { %v2614_v19 = vmul.f32 0.7978846, %v2613_v18 }
0x11a9   : > { %3822 = vtanh.f32 %v2614_v19 }
0x11b3   : > { %v3823_v2 = vpop.eup %3822 }
0x11b4   : > { %v2616_v20 = vadd.f32 1.0, %v3823_v2 }
0x11b6   : > { %v2617_v21 = vmul.f32 0.5, %v2616_v20 }
0x11b8   : > { %v2618_v7 = vmul.f32 %v2617_v21, %v2605_v11 }
0x11ba   : > { %v2619_v22 = vpack.c.bf16 %v2618_v7, %v2618_v7 }
0x11bc   : > { %3699 = vmatmul.mubr.msk.bf16.vlgmr.msra.gmra.mrb[48].mxu1 %vm2659_vm5, %v2619_v22 }
0x11bd   : > { %3703 = vmatpush3.bf16.msra.mxu1 (!%p3412_p8), %v3826_v45  ;;  %3706 = vmatprep.mubr.msk.bf16.mxu1 (!%p3412_p8), %vm3879_vm6, %v3878_v46 }
0x11be   : > { %3704 = vmatprep.subr.bf16.mxu1 (!%p3412_p8), %v3878_v46 }
0x11c1   : > { %3705 = vmatpush3.bf16.msra.mxu1 (!%p3412_p8), %v3827_v47 }
0x11c2   : > { %3710 = vmatprep.subr.bf16.mxu1 (!%p3412_p8), %v3878_v46 }
0x128f   : > { %v2697_v24 = vpop.f32.mrb[48].mxu1 }
0x1290   : > { %v2698_v25 = vadd.f32 %v3404_v23, %v2697_v24  ;;  %v3700_v26 = vpop.f32.mrb[49].mxu1 }
0x1291   : > { %v2700_v27 = vpop.f32.mrb[50].mxu1 }
0x1292   : > { %v3701_v28 = vpop.f32.mrb[51].mxu1  ;;  %v2703_v29 = vadd.f32 %v2698_v25, %v2542_v1 }
0x1294   : > { %v2706_v30 = vsel %vm1115_vm2, %v2703_v29, 0.0 }
0x1295   : > { %2707 = vadd.xlane.f32.xlu0 %v2706_v30 }
0x1322   : > { %v2708_v31 = vpop.xlane.xlu0 %2707 }
0x1323   : > { %v2709_v32 = vmul.f32 0.03125, %v2708_v31 }
0x1325   : > { %v2710_v33 = vsub.f32 %v2703_v29, %v2709_v32 }
0x1327   : > { %v2711_v34 = vmul.f32 %v2710_v33, %v2710_v33 }
0x1329   : > { %v2712_v35 = vsel %vm1115_vm2, %v2711_v34, 0.0 }
0x132a   : > { %2713 = vadd.xlane.f32.xlu1 %v2712_v35 }
0x13b7   : > { %v2714_v36 = vpop.xlane.xlu1 %2713 }
0x13b8   : > { %v2715_v37 = vmul.f32 0.03125, %v2714_v36 }
0x13ba   : > { %v2716_v38 = vadd.f32 1e-05, %v2715_v37 }
0x13bc   : > { %3824 = vrsqrt.f32 %v2716_v38 }
0x13c6   : > { %v3825_v39 = vpop.eup %3824 }
0x13c7   : > { %v2718_v41 = vmul.f32 %v3825_v39, %v2710_v33  ;;  %2737 = sbr.rel (%p3412_p8) target bundleno = 5731 (0x1663), region = 124 }
0x13c9   : > { %v2725_v43 = vmul.f32 %v3410_v40, %v2718_v41 }
0x13cb   : > { %v2732_v44 = vadd.f32 %v3411_v42, %v2725_v43 }
0x13cd   : > { %2733 = vst.msk [vmem:[#allocation2] sm:$0xff] %vm1115_vm2, %v2732_v44  ;;  %v2738_v48 = vpack.c.bf16 (!%p3412_p8), %v2732_v44, %v2732_v44 }
0x13cf   : > { %3707 = vmatmul.mubr.msk.bf16.vlgmr.msra.gmra.mrb[0].mxu1 %vm1115_vm2, %v2738_v48 }
0x13d0   : > { %3714 = vmatprep.mubr.msk.bf16.mxu1 %vm3879_vm6, %v3878_v46  ;;  %3711 = vmatpush3.bf16.msra.mxu1 %v3828_v49 }
0x13d1   : > { %3712 = vmatprep.subr.bf16.mxu1 %v3878_v46 }
0x13d4   : > { %3713 = vmatpush3.bf16.msra.mxu1 %v3829_v50 }
0x14a2   : > { %v2799_v54 = vpop.f32.mrb[0].mxu1 }
0x14a3   : > { %v2800_v55 = vadd.f32 %v3413_v53, %v2799_v54  ;;  %v3708_v5 = vpop.f32.mrb[1].mxu1 }
0x14a4   : > { %v2802_v56 = vpop.f32.mrb[2].mxu1 }
0x14a5   : > { %3834 = vtanh.f32 %v2800_v55  ;;  %v3709_v57 = vpop.f32.mrb[3].mxu1 }
0x14af   : > { %v3835_v58 = vpop.eup %3834 }
0x14b0   : > { %v2806_v59 = vpack.c.bf16 %v3835_v58, %v3835_v58 }
0x14b2   : > { %3715 = vmatmul.mubr.msk.bf16.vlgmr.msra.gmra.mrb[4].mxu1 %vm1115_vm2, %v2806_v59 }
0x1585   : > { %v2867_v63 = vpop.f32.mrb[4].mxu1 }
0x1586   : > { %v2868_v1 = vadd.f32 %v3417_v62, %v2867_v63  ;;  %v3716_v3 = vpop.f32.mrb[5].mxu1 }
0x1587   : > { %v2870_v4 = vpop.f32.mrb[6].mxu1 }
0x1588   : > { %v2873_v6 = vmax.f32 %v2868_v1, 0.0  ;;  %v3717_v8 = vpop.f32.mrb[7].mxu1 }
0x158a   : > { %v2874_v9 = vpack.c.bf16 %v2873_v6, %v2873_v6 }
0x158c   : > { %3727 = vmatmul.mubr.msk.bf16.vlgmr.msra.gmra.mrb[0].mxu0 %vm2659_vm5, %v2874_v9 }
0x165f   : > { %v2951_v10 = vpop.f32.mrb[0].mxu0 }
0x1660   : > { %v2952_v11 = vadd.f32 %v3421_v0, %v2951_v10  ;;  %v3728_v12 = vpop.f32.mrb[1].mxu0 }
0x1661   : > { %v2954_v13 = vpop.f32.mrb[2].mxu0 }
0x1662   : > { %2958 = vst.msk [vmem:[%s1071_s13] sm:$0xff] %vm2957_vm7, %v2952_v11  ;;  %v3729_v14 = vpop.f32.mrb[3].mxu0 }
0x1663 PF: > { %s4593_s1 = sld [smem:[#allocation6_spill]]  ;;  %s4594_s29 = sld [smem:[#allocation4_spill]] }
0x1664   : > { %s4595_s2 = sld [smem:[#allocation5_spill]]  ;;  %s4596_s6 = sld [smem:[#allocation7_spill]] }
0x1665   : > { %s4597_s30 = sld [smem:[#allocation8_spill]] }
0x1669   : > { %s36_s7 = sadd.s32 1, %s4593_s1  }
0x166a   : > { %p33_p9 = scmp.ge.s32.totalorder %s36_s7, 6  }
0x166c   :  { %35 = sbr.rel (!%p33_p9) target bundleno = 25 (0x19), region = 241 }

</bundles_post_ra>
